<compile_context>
chip_gen: v6e
topology: v6e:2x2x1
jax: 0.10.0
libtpu: 0.0.40
codegen_flags: <defaults>
</compile_context>

<pallas_src>
import functools

import jax
import jax.numpy as jnp
import numpy as np
from jax.experimental import pallas as pl
from jax.experimental.pallas import tpu as pltpu

EPS = 1e-5


def _round_up(n, m):
    return ((n + m - 1) // m) * m


def _vmem_capacity_bytes():
    # Generation-aware VMEM capacity per TensorCore; fall back to the most
    # conservative value (v7x: 64 MiB) if the query is unavailable.
    try:
        return int(pltpu.get_tpu_info().vmem_capacity_bytes)
    except Exception:
        return 64 << 20


# ----------------------------------------------------------------------------
# Pallas kernel: one grid step == one *group* of (coupling + batchnorm) blocks.
# Flow state and running log|det J| live in u_ref / ladj_ref (resident across
# grid steps because their BlockSpec index map is constant); every block does a
# read-modify-write on them.
# ----------------------------------------------------------------------------
def realnvp_kernel(x_ref, w1_ref, wh_ref, wo_ref, dvec_ref, hvec_ref,
                   u_ref, ladj_ref, *, b_real, n_hidden, n_blocks, pad_blocks):
    g = pl.program_id(0)
    bpg = dvec_ref.shape[0]                  # flow blocks handled per grid step
    B_pad, D_pad = u_ref.shape
    H_pad = w1_ref.shape[-1] // 2
    cdt = w1_ref.dtype                       # dtype fed to the MXU (f32 or bf16)

    @pl.when(g == 0)
    def _():
        u_ref[...] = x_ref[...]
        ladj_ref[...] = jnp.zeros_like(ladj_ref)

    mask_rows = b_real < B_pad               # static: are there padded rows?
    inv_n = 1.0 / float(b_real)
    inv_nm1 = 1.0 / float(max(b_real - 1, 1))   # NOTE: torch gives NaN for B==1
    if mask_rows:
        row_ids = jax.lax.broadcasted_iota(jnp.int32, (B_pad, 1), 0)
        row_mask = (row_ids < b_real).astype(jnp.float32)   # (B_pad, 1)

    def run_block(j):
        x = u_ref[...]
        mask = dvec_ref[j, 0:1, :]           # (1, D_pad)
        one_m = 1.0 - mask
        mx = x * mask

        # ---- coupling: fused first layer of s_net / t_net (shared input) ----
        h01 = jnp.dot(mx.astype(cdt), w1_ref[j],
                      preferred_element_type=jnp.float32) + hvec_ref[j, 0:1, :]
        h_s = h01[:, :H_pad]                 # s-branch pre-activation
        h_t = h01[:, H_pad:]                 # t-branch pre-activation
        for k in range(n_hidden):
            h_s = (jnp.dot(jnp.tanh(h_s).astype(cdt),
                           wh_ref[(2 * j + 0) * n_hidden + k],
                           preferred_element_type=jnp.float32)
                   + hvec_ref[j, 1 + k:2 + k, :H_pad])
            h_t = (jnp.dot(jnp.maximum(h_t, 0.0).astype(cdt),
                           wh_ref[(2 * j + 1) * n_hidden + k],
                           preferred_element_type=jnp.float32)
                   + hvec_ref[j, 1 + k:2 + k, H_pad:])
        s = (jnp.dot(jnp.tanh(h_s).astype(cdt), wo_ref[2 * j + 0],
                     preferred_element_type=jnp.float32) + dvec_ref[j, 4:5, :])
        t = (jnp.dot(jnp.maximum(h_t, 0.0).astype(cdt), wo_ref[2 * j + 1],
                     preferred_element_type=jnp.float32) + dvec_ref[j, 5:6, :])

        u = mx + one_m * (x - t) * jnp.exp(-s)
        dladj = -one_m * s

        # ---- BatchNorm (training mode: batch mean, unbiased batch variance) --
        if mask_rows:
            mean = jnp.sum(u * row_mask, axis=0, keepdims=True) * inv_n
            diff = (u - mean) * row_mask     # padded rows -> 0 (then land on beta)
        else:
            mean = jnp.sum(u, axis=0, keepdims=True) * inv_n
            diff = u - mean
        var = jnp.sum(diff * diff, axis=0, keepdims=True) * inv_nm1
        rstd = jax.lax.rsqrt(var + EPS)
        gamma = dvec_ref[j, 1:2, :]
        # Folded affine apply: one mul + one add on the (B, D) tile.
        y = diff * (gamma * rstd) + dvec_ref[j, 3:4, :]
        dladj = dladj + (dvec_ref[j, 2:3, :] - 0.5 * jnp.log(var + EPS))

        u_ref[...] = y
        ladj_ref[...] = ladj_ref[...] + dladj

    for j in range(bpg):
        if pad_blocks and j >= bpg - pad_blocks:
            # Only the last group can contain padded (invalid) tail blocks.
            @pl.when(g * bpg + j < n_blocks)
            def _run(j=j):
                run_block(j)
        else:
            run_block(j)


# ----------------------------------------------------------------------------
# One-time packing: pad to lane/sublane-friendly shapes, fuse s/t first layers,
# and consolidate small per-block vectors into two slabs.
# ----------------------------------------------------------------------------
def pack_params(params, weights_dtype=jnp.float32):
    n_blocks, _, D, H = params["w1"].shape
    n_hidden = params["wh"].shape[1] // 2
    D_pad = _round_up(D, 128)
    H_pad = _round_up(H, 128)

    def pad_last(a, target):
        return jnp.pad(a, [(0, 0)] * (a.ndim - 1) + [(0, target - a.shape[-1])])

    # Fused first layer: (n_blocks, D_pad, 2*H_pad), s branch then t branch.
    w1s = jnp.pad(params["w1"][:, 0], ((0, 0), (0, D_pad - D), (0, H_pad - H)))
    w1t = jnp.pad(params["w1"][:, 1], ((0, 0), (0, D_pad - D), (0, H_pad - H)))
    w1 = jnp.concatenate([w1s, w1t], axis=-1).astype(weights_dtype)

    if n_hidden > 0:
        wh = jnp.pad(params["wh"],
                     ((0, 0), (0, 0), (0, H_pad - H), (0, H_pad - H)))
        wh = wh.reshape(n_blocks * 2 * n_hidden, H_pad, H_pad)
    else:
        wh = jnp.zeros((n_blocks * 2, H_pad, H_pad), jnp.float32)
    wh = wh.astype(weights_dtype)

    wo = jnp.pad(params["wo"], ((0, 0), (0, 0), (0, H_pad - H), (0, D_pad - D)))
    wo = wo.reshape(n_blocks * 2, H_pad, D_pad).astype(weights_dtype)

    # hvec slab (f32): row 0 = fused first-layer bias [b1_s | b1_t];
    # rows 1..n_hidden = [bh_s_k | bh_t_k].   Shape (nb, 1+n_hidden, 2*H_pad).
    b1s = pad_last(params["b1"][:, 0], H_pad)
    b1t = pad_last(params["b1"][:, 1], H_pad)
    rows = [jnp.concatenate([b1s, b1t], axis=-1)[:, None, :]]
    for k in range(n_hidden):
        bhs = pad_last(params["bh"][:, k], H_pad)                 # s branch, layer k
        bht = pad_last(params["bh"][:, n_hidden + k], H_pad)      # t branch, layer k
        rows.append(jnp.concatenate([bhs, bht], axis=-1)[:, None, :])
    hvec = jnp.concatenate(rows, axis=1).astype(jnp.float32)

    # dvec slab (f32): rows 0=mask, 1=gamma, 2=log_gamma, 3=beta, 4=bo_s, 5=bo_t.
    mask = pad_last(params["mask"], D_pad)
    lg = pad_last(params["log_gamma"], D_pad)
    gamma = jnp.exp(lg)                                           # host-side exp
    beta = pad_last(params["beta"], D_pad)
    bo_s = pad_last(params["bo"][:, 0], D_pad)
    bo_t = pad_last(params["bo"][:, 1], D_pad)
    zeros = jnp.zeros_like(mask)
    dvec = jnp.stack([mask, gamma, lg, beta, bo_s, bo_t, zeros, zeros],
                     axis=1).astype(jnp.float32)                  # (nb, 8, D_pad)

    return dict(w1=w1, wh=wh, wo=wo, dvec=dvec, hvec=hvec)


# ----------------------------------------------------------------------------
# Wrapper
# ----------------------------------------------------------------------------
@functools.partial(jax.jit, static_argnames=("n_hidden",))
def realnvp_forward(x, packed, *, n_hidden):
    B = x.shape[0]
    xf = x.reshape(B, -1).astype(jnp.float32)          # x.view(B, -1)
    D = xf.shape[1]

    n_blocks = packed["dvec"].shape[0]
    D_pad = packed["dvec"].shape[-1]
    H_pad = packed["w1"].shape[-1] // 2
    n_h_stack = packed["wh"].shape[0] // (n_blocks * 2)
    wbytes = packed["w1"].dtype.itemsize
    B_pad = _round_up(B, 8)
    xp = jnp.pad(xf, ((0, B_pad - B), (0, D_pad - D)))

    # ---- generation-aware VMEM budget -> blocks-per-grid-step (bpg) ---------
    vmem_cap = _vmem_capacity_bytes()
    if vmem_cap <= (64 << 20):        # v7x-class: 64 MiB per TensorCore
        weight_budget, vmem_cap_limit = 24 << 20, 40 << 20
    else:                             # v5e / v6e: 128 MiB
        weight_budget, vmem_cap_limit = 64 << 20, 96 << 20

    per_block_bytes = (wbytes * (D_pad * 2 * H_pad                 # w1 (fused)
                                 + 2 * n_h_stack * H_pad * H_pad   # wh
                                 + 2 * H_pad * D_pad)              # wo
                       + 4 * (8 * D_pad                            # dvec slab
                              + (1 + n_hidden) * 2 * H_pad))       # hvec slab
    bpg = int(max(1, min(n_blocks, weight_budget // (2 * per_block_bytes))))
    n_groups = (n_blocks + bpg - 1) // bpg
    pad_blocks = n_groups * bpg - n_blocks

    w1, wh, wo = packed["w1"], packed["wh"], packed["wo"]
    dvec, hvec = packed["dvec"], packed["hvec"]
    if pad_blocks:
        # Pad stacked weights to a multiple of bpg; tail blocks are pl.when-guarded.
        w1 = jnp.pad(w1, ((0, pad_blocks), (0, 0), (0, 0)))
        wh = jnp.pad(wh, ((0, pad_blocks * 2 * n_h_stack), (0, 0), (0, 0)))
        wo = jnp.pad(wo, ((0, pad_blocks * 2), (0, 0), (0, 0)))
        dvec = jnp.pad(dvec, ((0, pad_blocks), (0, 0), (0, 0)))
        hvec = jnp.pad(hvec, ((0, pad_blocks), (0, 0), (0, 0)))

    state_bytes = 6 * B_pad * D_pad * 4        # x (2 bufs) + u + ladj (2 each)
    vmem_need = 2 * bpg * per_block_bytes + state_bytes + (2 << 20)
    vmem_limit = int(min(max(vmem_need, 16 << 20), vmem_cap_limit))

    kernel = functools.partial(realnvp_kernel, b_real=B, n_hidden=n_hidden,
                               n_blocks=n_blocks, pad_blocks=pad_blocks)

    grid_spec = pltpu.PrefetchScalarGridSpec(
        num_scalar_prefetch=0,
        grid=(n_groups,),
        in_specs=[
            pl.BlockSpec((B_pad, D_pad), lambda g: (0, 0)),                        # x
            pl.BlockSpec((bpg, D_pad, 2 * H_pad), lambda g: (g, 0, 0)),            # w1 fused
            pl.BlockSpec((bpg * 2 * n_h_stack, H_pad, H_pad), lambda g: (g, 0, 0)),  # wh
            pl.BlockSpec((bpg * 2, H_pad, D_pad), lambda g: (g, 0, 0)),            # wo
            pl.BlockSpec((bpg, 8, D_pad), lambda g: (g, 0, 0)),                    # dvec slab
            pl.BlockSpec((bpg, 1 + n_hidden, 2 * H_pad), lambda g: (g, 0, 0)),     # hvec slab
        ],
        out_specs=[
            pl.BlockSpec((B_pad, D_pad), lambda g: (0, 0)),                        # u (state)
            pl.BlockSpec((B_pad, D_pad), lambda g: (0, 0)),                        # sum log|det J|
        ],
    )

    u_p, ladj_p = pl.pallas_call(
        kernel,
        out_shape=(jax.ShapeDtypeStruct((B_pad, D_pad), jnp.float32),
                   jax.ShapeDtypeStruct((B_pad, D_pad), jnp.float32)),
        grid_spec=grid_spec,
        compiler_params=pltpu.CompilerParams(
            dimension_semantics=("arbitrary",),      # flow blocks are sequential
            vmem_limit_bytes=vmem_limit),
    )(xp, w1, wh, wo, dvec, hvec)

    return u_p[:B, :D], ladj_p[:B, :D]


# ----------------------------------------------------------------------------
# Deterministic parameter construction (logical / PyTorch-like layout).
# ----------------------------------------------------------------------------
def init_params(key, n_blocks, input_size, hidden_size, n_hidden):
    D, H = input_size, hidden_size
    ks = jax.random.split(key, 6)
    scale = 0.1
    w1 = scale * jax.random.normal(ks[0], (n_blocks, 2, D, H), jnp.float32)
    b1 = scale * jax.random.normal(ks[1], (n_blocks, 2, H), jnp.float32)
    wh = scale * jax.random.normal(ks[2], (n_blocks, 2 * n_hidden, H, H), jnp.float32)
    bh = scale * jax.random.normal(ks[3], (n_blocks, 2 * n_hidden, H), jnp.float32)
    wo = scale * jax.random.normal(ks[4], (n_blocks, 2, H, D), jnp.float32)
    bo = scale * jax.random.normal(ks[5], (n_blocks, 2, D), jnp.float32)
    # BatchNorm params are zero-initialized, exactly as in the module.
    log_gamma = jnp.zeros((n_blocks, D), jnp.float32)
    beta = jnp.zeros((n_blocks, D), jnp.float32)
    # Alternating binary mask, flipped each block (mask = 1 - mask).
    base = (jnp.arange(D) % 2).astype(jnp.float32)
    mask = jnp.stack([base if i % 2 == 0 else 1.0 - base for i in range(n_blocks)])
    return dict(mask=mask, w1=w1, b1=b1, wh=wh, bh=bh, wo=wo, bo=bo,
                log_gamma=log_gamma, beta=beta)


# ----------------------------------------------------------------------------
# Pure-JAX reference (for correctness check only).
# ----------------------------------------------------------------------------
def ref_forward(x, params, n_hidden):
    B = x.shape[0]
    xf = x.reshape(B, -1).astype(jnp.float32)
    n_blocks = params["mask"].shape[0]
    sum_ladj = jnp.zeros_like(xf)
    xcur = xf
    for i in range(n_blocks):
        mask = params["mask"][i]
        mx = xcur * mask

        def mlp(branch, act):
            h = mx @ params["w1"][i, branch] + params["b1"][i, branch]
            for j in range(n_hidden):
                h = act(h)
                h = h @ params["wh"][i, branch * n_hidden + j] \
                    + params["bh"][i, branch * n_hidden + j]
            h = act(h)
            return h @ params["wo"][i, branch] + params["bo"][i, branch]

        s = mlp(0, jnp.tanh)
        t = mlp(1, lambda z: jnp.maximum(z, 0.0))
        u = mx + (1.0 - mask) * (xcur - t) * jnp.exp(-s)
        ladj = -(1.0 - mask) * s

        mean = u.mean(0)
        var = u.var(0, ddof=1)                  # torch.var default: unbiased
        x_hat = (u - mean) / jnp.sqrt(var + EPS)
        lg = params["log_gamma"][i]
        y = jnp.exp(lg) * x_hat + params["beta"][i]
        ladj_bn = lg - 0.5 * jnp.log(var + EPS)

        xcur = y
        sum_ladj = sum_ladj + ladj + ladj_bn
    return xcur, sum_ladj


if __name__ == "__main__":
    # Small config: RealNVP(n_blocks=2, input_size=16, hidden_size=32, n_hidden=1)
    n_blocks, input_size, hidden_size, n_hidden = 2, 16, 32, 1
    B, C, Hs, Ws = 8, 1, 4, 4                   # C*Hs*Ws == input_size

    key = jax.random.PRNGKey(0)
    kx, kp = jax.random.split(key)
    x = jax.random.normal(kx, (B, C, Hs, Ws), jnp.float32)   # NCHW, like PyTorch
    params = init_params(kp, n_blocks, input_size, hidden_size, n_hidden)

    u_expect, ladj_expect = ref_forward(x, params, n_hidden)

    # f32 weight path: strict parity with the pure-JAX reference.
    packed_f32 = pack_params(params, weights_dtype=jnp.float32)
    u, sum_ladj = realnvp_forward(x, packed_f32, n_hidden=n_hidden)
    u, sum_ladj = jax.block_until_ready((u, sum_ladj))
    np.testing.assert_allclose(np.asarray(u), np.asarray(u_expect),
                               rtol=1e-5, atol=1e-5)
    np.testing.assert_allclose(np.asarray(sum_ladj), np.asarray(ladj_expect),
                               rtol=1e-5, atol=1e-5)

    # bf16 weight-streaming path (performance configuration): loose tolerance.
    packed_bf16 = pack_params(params, weights_dtype=jnp.bfloat16)
    u2, ladj2 = jax.block_until_ready(
        realnvp_forward(x, packed_bf16, n_hidden=n_hidden))
    np.testing.assert_allclose(np.asarray(u2), np.asarray(u_expect),
                               rtol=1e-1, atol=1e-1)
    np.testing.assert_allclose(np.asarray(ladj2), np.asarray(ladj_expect),
                               rtol=1e-1, atol=1e-1)

    print("KERNEL_OK")
</pallas_src>

<mosaic_0001>
module attributes {stable_mosaic.version = 11 : i64} {
  func.func @realnvp_kernel(%arg0: i32, %arg1: memref<8x128xf32, #tpu.memory_space<vmem>>, %arg2: memref<2x128x256xf32, #tpu.memory_space<vmem>>, %arg3: memref<4x128x128xf32, #tpu.memory_space<vmem>>, %arg4: memref<4x128x128xf32, #tpu.memory_space<vmem>>, %arg5: memref<2x8x128xf32, #tpu.memory_space<vmem>>, %arg6: memref<2x2x256xf32, #tpu.memory_space<vmem>>, %arg7: memref<8x128xf32, #tpu.memory_space<vmem>>, %arg8: memref<8x128xf32, #tpu.memory_space<vmem>>) attributes {dimension_semantics = [#tpu.dimension_semantics<arbitrary>], iteration_bounds = array<i64: 1>, scalar_prefetch = 0 : i64, scratch_operands = 0 : i64, tpu.core_type = #tpu.core_type<tc>, window_params = [{pipeline_mode = #tpu.pipeline_mode<synchronous>, transform_indices = @transform_0, window_bounds = array<i64: 8, 128>}, {transform_indices = @transform_1, window_bounds = array<i64: 2, 128, 256>}, {transform_indices = @transform_2, window_bounds = array<i64: 4, 128, 128>}, {transform_indices = @transform_3, window_bounds = array<i64: 4, 128, 128>}, {transform_indices = @transform_4, window_bounds = array<i64: 2, 8, 128>}, {transform_indices = @transform_5, window_bounds = array<i64: 2, 2, 256>}, {pipeline_mode = #tpu.pipeline_mode<synchronous>, transform_indices = @transform_6, window_bounds = array<i64: 8, 128>}, {pipeline_mode = #tpu.pipeline_mode<synchronous>, transform_indices = @transform_7, window_bounds = array<i64: 8, 128>}]} {
    %c0_i32 = arith.constant 0 : i32
    %0 = arith.cmpi eq, %arg0, %c0_i32 : i32
    %1 = arith.extui %0 : i1 to i32
    %c0_i32_0 = arith.constant 0 : i32
    %2 = arith.cmpi ne, %1, %c0_i32_0 : i32
    scf.if %2 {
      %c0_127 = arith.constant 0 : index
      %c0_128 = arith.constant 0 : index
      %201 = vector.load %arg1[%c0_127, %c0_128] : memref<8x128xf32, #tpu.memory_space<vmem>>, vector<8x128xf32>
      %c0_129 = arith.constant 0 : index
      %c0_130 = arith.constant 0 : index
      %202 = vector.load %arg7[%c0_129, %c0_130] : memref<8x128xf32, #tpu.memory_space<vmem>>, vector<8x128xf32>
      tpu.vector_store %arg7[%c0_129, %c0_130], %201 {strides = array<i32>} : memref<8x128xf32, #tpu.memory_space<vmem>>, vector<8x128xf32>,
      %cst_131 = arith.constant 0.000000e+00 : f32
      %203 = vector.broadcast %cst_131 : f32 to vector<8x128xf32>
      %c0_132 = arith.constant 0 : index
      %c0_133 = arith.constant 0 : index
      %204 = vector.load %arg8[%c0_132, %c0_133] : memref<8x128xf32, #tpu.memory_space<vmem>>, vector<8x128xf32>
      tpu.vector_store %arg8[%c0_132, %c0_133], %203 {strides = array<i32>} : memref<8x128xf32, #tpu.memory_space<vmem>>, vector<8x128xf32>,
    } else {
    }
    %c0 = arith.constant 0 : index
    %c0_1 = arith.constant 0 : index
    %3 = vector.load %arg7[%c0, %c0_1] : memref<8x128xf32, #tpu.memory_space<vmem>>, vector<8x128xf32>
    %c0_2 = arith.constant 0 : index
    %c0_3 = arith.constant 0 : index
    %c0_4 = arith.constant 0 : index
    %4 = vector.load %arg5[%c0_2, %c0_3, %c0_4] : memref<2x8x128xf32, #tpu.memory_space<vmem>>, vector<1x1x128xf32>
    %5 = vector.shape_cast %4 : vector<1x1x128xf32> to vector<1x128xf32>
    %cst = arith.constant 1.000000e+00 : f32
    %6 = vector.broadcast %cst : f32 to vector<1x128xf32>
    %7 = arith.subf %6, %5 : vector<1x128xf32>
    %8 = vector.broadcast %5 : vector<1x128xf32> to vector<8x128xf32>
    %9 = arith.mulf %3, %8 : vector<8x128xf32>
    %c0_5 = arith.constant 0 : index
    %c0_6 = arith.constant 0 : index
    %c0_7 = arith.constant 0 : index
    %10 = vector.load %arg2[%c0_5, %c0_6, %c0_7] : memref<2x128x256xf32, #tpu.memory_space<vmem>>, vector<1x128x256xf32>
    %11 = vector.shape_cast %10 : vector<1x128x256xf32> to vector<128x256xf32>
    %cst_8 = arith.constant dense<0.000000e+00> : vector<8x256xf32>
    %12 = tpu.matmul %9, %11, %cst_8 {dimension_numbers = #tpu.dot_dimension_numbers<[1], [0], [0], [1], [0, 0, 1, 1], [], []>} : vector<8x128xf32>, vector<128x256xf32>, vector<8x256xf32> -> vector<8x256xf32>
    %c0_9 = arith.constant 0 : index
    %c0_10 = arith.constant 0 : index
    %c0_11 = arith.constant 0 : index
    %13 = vector.load %arg6[%c0_9, %c0_10, %c0_11] : memref<2x2x256xf32, #tpu.memory_space<vmem>>, vector<1x1x256xf32>
    %14 = vector.shape_cast %13 : vector<1x1x256xf32> to vector<1x256xf32>
    %15 = vector.broadcast %14 : vector<1x256xf32> to vector<8x256xf32>
    %16 = arith.addf %12, %15 : vector<8x256xf32>
    %17 = vector.extract_strided_slice %16 {offsets = [0, 0], sizes = [8, 128], strides = [1, 1]} : vector<8x256xf32> to vector<8x128xf32>
    %18 = vector.extract_strided_slice %16 {offsets = [0, 128], sizes = [8, 128], strides = [1, 1]} : vector<8x256xf32> to vector<8x128xf32>
    %19 = math.tanh %17 : vector<8x128xf32>
    %c0_12 = arith.constant 0 : index
    %c0_13 = arith.constant 0 : index
    %c0_14 = arith.constant 0 : index
    %20 = vector.load %arg3[%c0_12, %c0_13, %c0_14] : memref<4x128x128xf32, #tpu.memory_space<vmem>>, vector<1x128x128xf32>
    %21 = vector.shape_cast %20 : vector<1x128x128xf32> to vector<128x128xf32>
    %cst_15 = arith.constant dense<0.000000e+00> : vector<8x128xf32>
    %22 = tpu.matmul %19, %21, %cst_15 {dimension_numbers = #tpu.dot_dimension_numbers<[1], [0], [0], [1], [0, 0, 1, 1], [], []>} : vector<8x128xf32>, vector<128x128xf32>, vector<8x128xf32> -> vector<8x128xf32>
    %c0_16 = arith.constant 0 : index
    %c1 = arith.constant 1 : index
    %c0_17 = arith.constant 0 : index
    %23 = vector.load %arg6[%c0_16, %c1, %c0_17] : memref<2x2x256xf32, #tpu.memory_space<vmem>>, vector<1x1x128xf32>
    %24 = vector.shape_cast %23 : vector<1x1x128xf32> to vector<1x128xf32>
    %25 = vector.broadcast %24 : vector<1x128xf32> to vector<8x128xf32>
    %26 = arith.addf %22, %25 : vector<8x128xf32>
    %cst_18 = arith.constant 0.000000e+00 : f32
    %27 = vector.broadcast %cst_18 : f32 to vector<8x128xf32>
    %28 = arith.maximumf %18, %27 : vector<8x128xf32>
    %c1_19 = arith.constant 1 : index
    %c0_20 = arith.constant 0 : index
    %c0_21 = arith.constant 0 : index
    %29 = vector.load %arg3[%c1_19, %c0_20, %c0_21] : memref<4x128x128xf32, #tpu.memory_space<vmem>>, vector<1x128x128xf32>
    %30 = vector.shape_cast %29 : vector<1x128x128xf32> to vector<128x128xf32>
    %cst_22 = arith.constant dense<0.000000e+00> : vector<8x128xf32>
    %31 = tpu.matmul %28, %30, %cst_22 {dimension_numbers = #tpu.dot_dimension_numbers<[1], [0], [0], [1], [0, 0, 1, 1], [], []>} : vector<8x128xf32>, vector<128x128xf32>, vector<8x128xf32> -> vector<8x128xf32>
    %c0_23 = arith.constant 0 : index
    %c1_24 = arith.constant 1 : index
    %c128 = arith.constant 128 : index
    %32 = vector.load %arg6[%c0_23, %c1_24, %c128] : memref<2x2x256xf32, #tpu.memory_space<vmem>>, vector<1x1x128xf32>
    %33 = vector.shape_cast %32 : vector<1x1x128xf32> to vector<1x128xf32>
    %34 = vector.broadcast %33 : vector<1x128xf32> to vector<8x128xf32>
    %35 = arith.addf %31, %34 : vector<8x128xf32>
    %36 = math.tanh %26 : vector<8x128xf32>
    %c0_25 = arith.constant 0 : index
    %c0_26 = arith.constant 0 : index
    %c0_27 = arith.constant 0 : index
    %37 = vector.load %arg4[%c0_25, %c0_26, %c0_27] : memref<4x128x128xf32, #tpu.memory_space<vmem>>, vector<1x128x128xf32>
    %38 = vector.shape_cast %37 : vector<1x128x128xf32> to vector<128x128xf32>
    %cst_28 = arith.constant dense<0.000000e+00> : vector<8x128xf32>
    %39 = tpu.matmul %36, %38, %cst_28 {dimension_numbers = #tpu.dot_dimension_numbers<[1], [0], [0], [1], [0, 0, 1, 1], [], []>} : vector<8x128xf32>, vector<128x128xf32>, vector<8x128xf32> -> vector<8x128xf32>
    %c0_29 = arith.constant 0 : index
    %c4 = arith.constant 4 : index
    %c0_30 = arith.constant 0 : index
    %40 = vector.load %arg5[%c0_29, %c4, %c0_30] : memref<2x8x128xf32, #tpu.memory_space<vmem>>, vector<1x1x128xf32>
    %41 = vector.shape_cast %40 : vector<1x1x128xf32> to vector<1x128xf32>
    %42 = vector.broadcast %41 : vector<1x128xf32> to vector<8x128xf32>
    %43 = arith.addf %39, %42 : vector<8x128xf32>
    %cst_31 = arith.constant 0.000000e+00 : f32
    %44 = vector.broadcast %cst_31 : f32 to vector<8x128xf32>
    %45 = arith.maximumf %35, %44 : vector<8x128xf32>
    %c1_32 = arith.constant 1 : index
    %c0_33 = arith.constant 0 : index
    %c0_34 = arith.constant 0 : index
    %46 = vector.load %arg4[%c1_32, %c0_33, %c0_34] : memref<4x128x128xf32, #tpu.memory_space<vmem>>, vector<1x128x128xf32>
    %47 = vector.shape_cast %46 : vector<1x128x128xf32> to vector<128x128xf32>
    %cst_35 = arith.constant dense<0.000000e+00> : vector<8x128xf32>
    %48 = tpu.matmul %45, %47, %cst_35 {dimension_numbers = #tpu.dot_dimension_numbers<[1], [0], [0], [1], [0, 0, 1, 1], [], []>} : vector<8x128xf32>, vector<128x128xf32>, vector<8x128xf32> -> vector<8x128xf32>
    %c0_36 = arith.constant 0 : index
    %c5 = arith.constant 5 : index
    %c0_37 = arith.constant 0 : index
    %49 = vector.load %arg5[%c0_36, %c5, %c0_37] : memref<2x8x128xf32, #tpu.memory_space<vmem>>, vector<1x1x128xf32>
    %50 = vector.shape_cast %49 : vector<1x1x128xf32> to vector<1x128xf32>
    %51 = vector.broadcast %50 : vector<1x128xf32> to vector<8x128xf32>
    %52 = arith.addf %48, %51 : vector<8x128xf32>
    %53 = arith.subf %3, %52 : vector<8x128xf32>
    %54 = vector.broadcast %7 : vector<1x128xf32> to vector<8x128xf32>
    %55 = arith.mulf %54, %53 : vector<8x128xf32>
    %cst_38 = arith.constant 0.000000e+00 : f32
    %56 = vector.broadcast %cst_38 : f32 to vector<8x128xf32>
    %57 = arith.subf %56, %43 : vector<8x128xf32>
    %58 = math.exp %57 : vector<8x128xf32>
    %59 = arith.mulf %55, %58 : vector<8x128xf32>
    %60 = arith.addf %9, %59 : vector<8x128xf32>
    %cst_39 = arith.constant 0.000000e+00 : f32
    %61 = vector.broadcast %cst_39 : f32 to vector<1x128xf32>
    %62 = arith.subf %61, %7 : vector<1x128xf32>
    %63 = vector.broadcast %62 : vector<1x128xf32> to vector<8x128xf32>
    %64 = arith.mulf %63, %43 : vector<8x128xf32>
    %cst_40 = arith.constant dense<0.000000e+00> : vector<128xf32>
    %65 = vector.multi_reduction <add>, %60, %cst_40 [0] : vector<8x128xf32> to vector<128xf32>
    %66 = vector.shape_cast %65 : vector<128xf32> to vector<1x128xf32>
    %cst_41 = arith.constant 1.250000e-01 : f32
    %67 = vector.broadcast %cst_41 : f32 to vector<1x128xf32>
    %68 = arith.mulf %66, %67 : vector<1x128xf32>
    %69 = vector.broadcast %68 : vector<1x128xf32> to vector<8x128xf32>
    %70 = arith.subf %60, %69 : vector<8x128xf32>
    %71 = arith.mulf %70, %70 : vector<8x128xf32>
    %cst_42 = arith.constant dense<0.000000e+00> : vector<128xf32>
    %72 = vector.multi_reduction <add>, %71, %cst_42 [0] : vector<8x128xf32> to vector<128xf32>
    %73 = vector.shape_cast %72 : vector<128xf32> to vector<1x128xf32>
    %cst_43 = arith.constant 0.142857149 : f32
    %74 = vector.broadcast %cst_43 : f32 to vector<1x128xf32>
    %75 = arith.mulf %73, %74 : vector<1x128xf32>
    %cst_44 = arith.constant 9.99999974E-6 : f32
    %76 = vector.broadcast %cst_44 : f32 to vector<1x128xf32>
    %77 = arith.addf %75, %76 : vector<1x128xf32>
    %78 = math.rsqrt %77 : vector<1x128xf32>
    %c0_45 = arith.constant 0 : index
    %c1_46 = arith.constant 1 : index
    %c0_47 = arith.constant 0 : index
    %79 = vector.load %arg5[%c0_45, %c1_46, %c0_47] : memref<2x8x128xf32, #tpu.memory_space<vmem>>, vector<1x1x128xf32>
    %80 = vector.shape_cast %79 : vector<1x1x128xf32> to vector<1x128xf32>
    %81 = arith.mulf %80, %78 : vector<1x128xf32>
    %82 = vector.broadcast %81 : vector<1x128xf32> to vector<8x128xf32>
    %83 = arith.mulf %70, %82 : vector<8x128xf32>
    %c0_48 = arith.constant 0 : index
    %c3 = arith.constant 3 : index
    %c0_49 = arith.constant 0 : index
    %84 = vector.load %arg5[%c0_48, %c3, %c0_49] : memref<2x8x128xf32, #tpu.memory_space<vmem>>, vector<1x1x128xf32>
    %85 = vector.shape_cast %84 : vector<1x1x128xf32> to vector<1x128xf32>
    %86 = vector.broadcast %85 : vector<1x128xf32> to vector<8x128xf32>
    %87 = arith.addf %83, %86 : vector<8x128xf32>
    %c0_50 = arith.constant 0 : index
    %c2 = arith.constant 2 : index
    %c0_51 = arith.constant 0 : index
    %88 = vector.load %arg5[%c0_50, %c2, %c0_51] : memref<2x8x128xf32, #tpu.memory_space<vmem>>, vector<1x1x128xf32>
    %89 = vector.shape_cast %88 : vector<1x1x128xf32> to vector<1x128xf32>
    %cst_52 = arith.constant 9.99999974E-6 : f32
    %90 = vector.broadcast %cst_52 : f32 to vector<1x128xf32>
    %91 = arith.addf %75, %90 : vector<1x128xf32>
    %92 = math.log %91 : vector<1x128xf32>
    %cst_53 = arith.constant 5.000000e-01 : f32
    %93 = vector.broadcast %cst_53 : f32 to vector<1x128xf32>
    %94 = arith.mulf %93, %92 : vector<1x128xf32>
    %95 = arith.subf %89, %94 : vector<1x128xf32>
    %96 = vector.broadcast %95 : vector<1x128xf32> to vector<8x128xf32>
    %97 = arith.addf %64, %96 : vector<8x128xf32>
    %c0_54 = arith.constant 0 : index
    %c0_55 = arith.constant 0 : index
    %98 = vector.load %arg7[%c0_54, %c0_55] : memref<8x128xf32, #tpu.memory_space<vmem>>, vector<8x128xf32>
    tpu.vector_store %arg7[%c0_54, %c0_55], %87 {strides = array<i32>} : memref<8x128xf32, #tpu.memory_space<vmem>>, vector<8x128xf32>,
    %c0_56 = arith.constant 0 : index
    %c0_57 = arith.constant 0 : index
    %99 = vector.load %arg8[%c0_56, %c0_57] : memref<8x128xf32, #tpu.memory_space<vmem>>, vector<8x128xf32>
    %100 = arith.addf %99, %97 : vector<8x128xf32>
    %c0_58 = arith.constant 0 : index
    %c0_59 = arith.constant 0 : index
    %101 = vector.load %arg8[%c0_58, %c0_59] : memref<8x128xf32, #tpu.memory_space<vmem>>, vector<8x128xf32>
    tpu.vector_store %arg8[%c0_58, %c0_59], %100 {strides = array<i32>} : memref<8x128xf32, #tpu.memory_space<vmem>>, vector<8x128xf32>,
    %c0_60 = arith.constant 0 : index
    %c0_61 = arith.constant 0 : index
    %102 = vector.load %arg7[%c0_60, %c0_61] : memref<8x128xf32, #tpu.memory_space<vmem>>, vector<8x128xf32>
    %c1_62 = arith.constant 1 : index
    %c0_63 = arith.constant 0 : index
    %c0_64 = arith.constant 0 : index
    %103 = vector.load %arg5[%c1_62, %c0_63, %c0_64] : memref<2x8x128xf32, #tpu.memory_space<vmem>>, vector<1x1x128xf32>
    %104 = vector.shape_cast %103 : vector<1x1x128xf32> to vector<1x128xf32>
    %cst_65 = arith.constant 1.000000e+00 : f32
    %105 = vector.broadcast %cst_65 : f32 to vector<1x128xf32>
    %106 = arith.subf %105, %104 : vector<1x128xf32>
    %107 = vector.broadcast %104 : vector<1x128xf32> to vector<8x128xf32>
    %108 = arith.mulf %102, %107 : vector<8x128xf32>
    %c1_66 = arith.constant 1 : index
    %c0_67 = arith.constant 0 : index
    %c0_68 = arith.constant 0 : index
    %109 = vector.load %arg2[%c1_66, %c0_67, %c0_68] : memref<2x128x256xf32, #tpu.memory_space<vmem>>, vector<1x128x256xf32>
    %110 = vector.shape_cast %109 : vector<1x128x256xf32> to vector<128x256xf32>
    %cst_69 = arith.constant dense<0.000000e+00> : vector<8x256xf32>
    %111 = tpu.matmul %108, %110, %cst_69 {dimension_numbers = #tpu.dot_dimension_numbers<[1], [0], [0], [1], [0, 0, 1, 1], [], []>} : vector<8x128xf32>, vector<128x256xf32>, vector<8x256xf32> -> vector<8x256xf32>
    %c1_70 = arith.constant 1 : index
    %c0_71 = arith.constant 0 : index
    %c0_72 = arith.constant 0 : index
    %112 = vector.load %arg6[%c1_70, %c0_71, %c0_72] : memref<2x2x256xf32, #tpu.memory_space<vmem>>, vector<1x1x256xf32>
    %113 = vector.shape_cast %112 : vector<1x1x256xf32> to vector<1x256xf32>
    %114 = vector.broadcast %113 : vector<1x256xf32> to vector<8x256xf32>
    %115 = arith.addf %111, %114 : vector<8x256xf32>
    %116 = vector.extract_strided_slice %115 {offsets = [0, 0], sizes = [8, 128], strides = [1, 1]} : vector<8x256xf32> to vector<8x128xf32>
    %117 = vector.extract_strided_slice %115 {offsets = [0, 128], sizes = [8, 128], strides = [1, 1]} : vector<8x256xf32> to vector<8x128xf32>
    %118 = math.tanh %116 : vector<8x128xf32>
    %c2_73 = arith.constant 2 : index
    %c0_74 = arith.constant 0 : index
    %c0_75 = arith.constant 0 : index
    %119 = vector.load %arg3[%c2_73, %c0_74, %c0_75] : memref<4x128x128xf32, #tpu.memory_space<vmem>>, vector<1x128x128xf32>
    %120 = vector.shape_cast %119 : vector<1x128x128xf32> to vector<128x128xf32>
    %cst_76 = arith.constant dense<0.000000e+00> : vector<8x128xf32>
    %121 = tpu.matmul %118, %120, %cst_76 {dimension_numbers = #tpu.dot_dimension_numbers<[1], [0], [0], [1], [0, 0, 1, 1], [], []>} : vector<8x128xf32>, vector<128x128xf32>, vector<8x128xf32> -> vector<8x128xf32>
    %c1_77 = arith.constant 1 : index
    %c1_78 = arith.constant 1 : index
    %c0_79 = arith.constant 0 : index
    %122 = vector.load %arg6[%c1_77, %c1_78, %c0_79] : memref<2x2x256xf32, #tpu.memory_space<vmem>>, vector<1x1x128xf32>
    %123 = vector.shape_cast %122 : vector<1x1x128xf32> to vector<1x128xf32>
    %124 = vector.broadcast %123 : vector<1x128xf32> to vector<8x128xf32>
    %125 = arith.addf %121, %124 : vector<8x128xf32>
    %cst_80 = arith.constant 0.000000e+00 : f32
    %126 = vector.broadcast %cst_80 : f32 to vector<8x128xf32>
    %127 = arith.maximumf %117, %126 : vector<8x128xf32>
    %c3_81 = arith.constant 3 : index
    %c0_82 = arith.constant 0 : index
    %c0_83 = arith.constant 0 : index
    %128 = vector.load %arg3[%c3_81, %c0_82, %c0_83] : memref<4x128x128xf32, #tpu.memory_space<vmem>>, vector<1x128x128xf32>
    %129 = vector.shape_cast %128 : vector<1x128x128xf32> to vector<128x128xf32>
    %cst_84 = arith.constant dense<0.000000e+00> : vector<8x128xf32>
    %130 = tpu.matmul %127, %129, %cst_84 {dimension_numbers = #tpu.dot_dimension_numbers<[1], [0], [0], [1], [0, 0, 1, 1], [], []>} : vector<8x128xf32>, vector<128x128xf32>, vector<8x128xf32> -> vector<8x128xf32>
    %c1_85 = arith.constant 1 : index
    %c1_86 = arith.constant 1 : index
    %c128_87 = arith.constant 128 : index
    %131 = vector.load %arg6[%c1_85, %c1_86, %c128_87] : memref<2x2x256xf32, #tpu.memory_space<vmem>>, vector<1x1x128xf32>
    %132 = vector.shape_cast %131 : vector<1x1x128xf32> to vector<1x128xf32>
    %133 = vector.broadcast %132 : vector<1x128xf32> to vector<8x128xf32>
    %134 = arith.addf %130, %133 : vector<8x128xf32>
    %135 = math.tanh %125 : vector<8x128xf32>
    %c2_88 = arith.constant 2 : index
    %c0_89 = arith.constant 0 : index
    %c0_90 = arith.constant 0 : index
    %136 = vector.load %arg4[%c2_88, %c0_89, %c0_90] : memref<4x128x128xf32, #tpu.memory_space<vmem>>, vector<1x128x128xf32>
    %137 = vector.shape_cast %136 : vector<1x128x128xf32> to vector<128x128xf32>
    %cst_91 = arith.constant dense<0.000000e+00> : vector<8x128xf32>
    %138 = tpu.matmul %135, %137, %cst_91 {dimension_numbers = #tpu.dot_dimension_numbers<[1], [0], [0], [1], [0, 0, 1, 1], [], []>} : vector<8x128xf32>, vector<128x128xf32>, vector<8x128xf32> -> vector<8x128xf32>
    %c1_92 = arith.constant 1 : index
    %c4_93 = arith.constant 4 : index
    %c0_94 = arith.constant 0 : index
    %139 = vector.load %arg5[%c1_92, %c4_93, %c0_94] : memref<2x8x128xf32, #tpu.memory_space<vmem>>, vector<1x1x128xf32>
    %140 = vector.shape_cast %139 : vector<1x1x128xf32> to vector<1x128xf32>
    %141 = vector.broadcast %140 : vector<1x128xf32> to vector<8x128xf32>
    %142 = arith.addf %138, %141 : vector<8x128xf32>
    %cst_95 = arith.constant 0.000000e+00 : f32
    %143 = vector.broadcast %cst_95 : f32 to vector<8x128xf32>
    %144 = arith.maximumf %134, %143 : vector<8x128xf32>
    %c3_96 = arith.constant 3 : index
    %c0_97 = arith.constant 0 : index
    %c0_98 = arith.constant 0 : index
    %145 = vector.load %arg4[%c3_96, %c0_97, %c0_98] : memref<4x128x128xf32, #tpu.memory_space<vmem>>, vector<1x128x128xf32>
    %146 = vector.shape_cast %145 : vector<1x128x128xf32> to vector<128x128xf32>
    %cst_99 = arith.constant dense<0.000000e+00> : vector<8x128xf32>
    %147 = tpu.matmul %144, %146, %cst_99 {dimension_numbers = #tpu.dot_dimension_numbers<[1], [0], [0], [1], [0, 0, 1, 1], [], []>} : vector<8x128xf32>, vector<128x128xf32>, vector<8x128xf32> -> vector<8x128xf32>
    %c1_100 = arith.constant 1 : index
    %c5_101 = arith.constant 5 : index
    %c0_102 = arith.constant 0 : index
    %148 = vector.load %arg5[%c1_100, %c5_101, %c0_102] : memref<2x8x128xf32, #tpu.memory_space<vmem>>, vector<1x1x128xf32>
    %149 = vector.shape_cast %148 : vector<1x1x128xf32> to vector<1x128xf32>
    %150 = vector.broadcast %149 : vector<1x128xf32> to vector<8x128xf32>
    %151 = arith.addf %147, %150 : vector<8x128xf32>
    %152 = arith.subf %102, %151 : vector<8x128xf32>
    %153 = vector.broadcast %106 : vector<1x128xf32> to vector<8x128xf32>
    %154 = arith.mulf %153, %152 : vector<8x128xf32>
    %cst_103 = arith.constant 0.000000e+00 : f32
    %155 = vector.broadcast %cst_103 : f32 to vector<8x128xf32>
    %156 = arith.subf %155, %142 : vector<8x128xf32>
    %157 = math.exp %156 : vector<8x128xf32>
    %158 = arith.mulf %154, %157 : vector<8x128xf32>
    %159 = arith.addf %108, %158 : vector<8x128xf32>
    %cst_104 = arith.constant 0.000000e+00 : f32
    %160 = vector.broadcast %cst_104 : f32 to vector<1x128xf32>
    %161 = arith.subf %160, %106 : vector<1x128xf32>
    %162 = vector.broadcast %161 : vector<1x128xf32> to vector<8x128xf32>
    %163 = arith.mulf %162, %142 : vector<8x128xf32>
    %cst_105 = arith.constant dense<0.000000e+00> : vector<128xf32>
    %164 = vector.multi_reduction <add>, %159, %cst_105 [0] : vector<8x128xf32> to vector<128xf32>
    %165 = vector.shape_cast %164 : vector<128xf32> to vector<1x128xf32>
    %cst_106 = arith.constant 1.250000e-01 : f32
    %166 = vector.broadcast %cst_106 : f32 to vector<1x128xf32>
    %167 = arith.mulf %165, %166 : vector<1x128xf32>
    %168 = vector.broadcast %167 : vector<1x128xf32> to vector<8x128xf32>
    %169 = arith.subf %159, %168 : vector<8x128xf32>
    %170 = arith.mulf %169, %169 : vector<8x128xf32>
    %cst_107 = arith.constant dense<0.000000e+00> : vector<128xf32>
    %171 = vector.multi_reduction <add>, %170, %cst_107 [0] : vector<8x128xf32> to vector<128xf32>
    %172 = vector.shape_cast %171 : vector<128xf32> to vector<1x128xf32>
    %cst_108 = arith.constant 0.142857149 : f32
    %173 = vector.broadcast %cst_108 : f32 to vector<1x128xf32>
    %174 = arith.mulf %172, %173 : vector<1x128xf32>
    %cst_109 = arith.constant 9.99999974E-6 : f32
    %175 = vector.broadcast %cst_109 : f32 to vector<1x128xf32>
    %176 = arith.addf %174, %175 : vector<1x128xf32>
    %177 = math.rsqrt %176 : vector<1x128xf32>
    %c1_110 = arith.constant 1 : index
    %c1_111 = arith.constant 1 : index
    %c0_112 = arith.constant 0 : index
    %178 = vector.load %arg5[%c1_110, %c1_111, %c0_112] : memref<2x8x128xf32, #tpu.memory_space<vmem>>, vector<1x1x128xf32>
    %179 = vector.shape_cast %178 : vector<1x1x128xf32> to vector<1x128xf32>
    %180 = arith.mulf %179, %177 : vector<1x128xf32>
    %181 = vector.broadcast %180 : vector<1x128xf32> to vector<8x128xf32>
    %182 = arith.mulf %169, %181 : vector<8x128xf32>
    %c1_113 = arith.constant 1 : index
    %c3_114 = arith.constant 3 : index
    %c0_115 = arith.constant 0 : index
    %183 = vector.load %arg5[%c1_113, %c3_114, %c0_115] : memref<2x8x128xf32, #tpu.memory_space<vmem>>, vector<1x1x128xf32>
    %184 = vector.shape_cast %183 : vector<1x1x128xf32> to vector<1x128xf32>
    %185 = vector.broadcast %184 : vector<1x128xf32> to vector<8x128xf32>
    %186 = arith.addf %182, %185 : vector<8x128xf32>
    %c1_116 = arith.constant 1 : index
    %c2_117 = arith.constant 2 : index
    %c0_118 = arith.constant 0 : index
    %187 = vector.load %arg5[%c1_116, %c2_117, %c0_118] : memref<2x8x128xf32, #tpu.memory_space<vmem>>, vector<1x1x128xf32>
    %188 = vector.shape_cast %187 : vector<1x1x128xf32> to vector<1x128xf32>
    %cst_119 = arith.constant 9.99999974E-6 : f32
    %189 = vector.broadcast %cst_119 : f32 to vector<1x128xf32>
    %190 = arith.addf %174, %189 : vector<1x128xf32>
    %191 = math.log %190 : vector<1x128xf32>
    %cst_120 = arith.constant 5.000000e-01 : f32
    %192 = vector.broadcast %cst_120 : f32 to vector<1x128xf32>
    %193 = arith.mulf %192, %191 : vector<1x128xf32>
    %194 = arith.subf %188, %193 : vector<1x128xf32>
    %195 = vector.broadcast %194 : vector<1x128xf32> to vector<8x128xf32>
    %196 = arith.addf %163, %195 : vector<8x128xf32>
    %c0_121 = arith.constant 0 : index
    %c0_122 = arith.constant 0 : index
    %197 = vector.load %arg7[%c0_121, %c0_122] : memref<8x128xf32, #tpu.memory_space<vmem>>, vector<8x128xf32>
    tpu.vector_store %arg7[%c0_121, %c0_122], %186 {strides = array<i32>} : memref<8x128xf32, #tpu.memory_space<vmem>>, vector<8x128xf32>,
    %c0_123 = arith.constant 0 : index
    %c0_124 = arith.constant 0 : index
    %198 = vector.load %arg8[%c0_123, %c0_124] : memref<8x128xf32, #tpu.memory_space<vmem>>, vector<8x128xf32>
    %199 = arith.addf %198, %196 : vector<8x128xf32>
    %c0_125 = arith.constant 0 : index
    %c0_126 = arith.constant 0 : index
    %200 = vector.load %arg8[%c0_125, %c0_126] : memref<8x128xf32, #tpu.memory_space<vmem>>, vector<8x128xf32>
    tpu.vector_store %arg8[%c0_125, %c0_126], %199 {strides = array<i32>} : memref<8x128xf32, #tpu.memory_space<vmem>>, vector<8x128xf32>,
    return
  }
  func.func @transform_0(%arg0: i32) -> (i32, i32) {
    %c0_i32 = arith.constant 0 : i32
    %c0_i32_0 = arith.constant 0 : i32
    %c0_i32_1 = arith.constant 0 : i32
    return %c0_i32, %c0_i32_0 : i32, i32
  }
  func.func @transform_1(%arg0: i32) -> (i32, i32, i32) {
    %c0_i32 = arith.constant 0 : i32
    %c0_i32_0 = arith.constant 0 : i32
    %c0_i32_1 = arith.constant 0 : i32
    return %arg0, %c0_i32, %c0_i32_0 : i32, i32, i32
  }
  func.func @transform_2(%arg0: i32) -> (i32, i32, i32) {
    %c0_i32 = arith.constant 0 : i32
    %c0_i32_0 = arith.constant 0 : i32
    %c0_i32_1 = arith.constant 0 : i32
    return %arg0, %c0_i32, %c0_i32_0 : i32, i32, i32
  }
  func.func @transform_3(%arg0: i32) -> (i32, i32, i32) {
    %c0_i32 = arith.constant 0 : i32
    %c0_i32_0 = arith.constant 0 : i32
    %c0_i32_1 = arith.constant 0 : i32
    return %arg0, %c0_i32, %c0_i32_0 : i32, i32, i32
  }
  func.func @transform_4(%arg0: i32) -> (i32, i32, i32) {
    %c0_i32 = arith.constant 0 : i32
    %c0_i32_0 = arith.constant 0 : i32
    %c0_i32_1 = arith.constant 0 : i32
    return %arg0, %c0_i32, %c0_i32_0 : i32, i32, i32
  }
  func.func @transform_5(%arg0: i32) -> (i32, i32, i32) {
    %c0_i32 = arith.constant 0 : i32
    %c0_i32_0 = arith.constant 0 : i32
    %c0_i32_1 = arith.constant 0 : i32
    return %arg0, %c0_i32, %c0_i32_0 : i32, i32, i32
  }
  func.func @transform_6(%arg0: i32) -> (i32, i32) {
    %c0_i32 = arith.constant 0 : i32
    %c0_i32_0 = arith.constant 0 : i32
    %c0_i32_1 = arith.constant 0 : i32
    return %c0_i32, %c0_i32_0 : i32, i32
  }
  func.func @transform_7(%arg0: i32) -> (i32, i32) {
    %c0_i32 = arith.constant 0 : i32
    %c0_i32_0 = arith.constant 0 : i32
    %c0_i32_1 = arith.constant 0 : i32
    return %c0_i32, %c0_i32_0 : i32, i32
  }
}

</mosaic_0001>

<bundles_post_ra>
// kernel: realnvp_forward.1
= control target key start
LH: loop header
LB: loop body
LE: loop exit
PB: predicated region body
PF: predicated region fallthrough
CT: control target
= control target key end

     0   :  { %13 = vsyncpa [#allocation3], 0  ;;  %s2112_s0 = inlined_call_operand.vmem [shape: f32[8,128], index: 0, kind: input, shape index: {}]   ;;  %s2113_s1 = inlined_call_operand.hbm [shape: f32[2,128,256], index: 1, kind: input, shape index: {}]   ;;  %s2114_s2 = inlined_call_operand.hbm [shape: f32[4,128,128], index: 2, kind: input, shape index: {}]   ;;  %s2115_s3 = inlined_call_operand.hbm [shape: f32[4,128,128], index: 3, kind: input, shape index: {}]   ;;  %s2116_s4 = inlined_call_operand.vmem [shape: f32[2,8,128], index: 4, kind: input, shape index: {}]   ;;  %s2117_s5 = inlined_call_operand.vmem [shape: f32[2,2,256], index: 5, kind: input, shape index: {}]   ;;  %s2118_s6 = inlined_call_operand.hbm [shape: f32[8,128], index: 6, kind: output, shape index: {0}]   ;;  %s2119_s7 = inlined_call_operand.hbm [shape: f32[8,128], index: 7, kind: output, shape index: {1}]  }
   0x1   :  { %14 = vsyncpa [#allocation6], 0 }
   0x2   :  { %15 = vsyncpa [#allocation4], 0 }
   0x3   :  { %16 = vsyncpa [#allocation10], 0  ;;  %s1794_s24 = smov [#allocation5]  }
   0x4   :  { %s36_s25 = sshll.u32 %s1794_s24, 4  ;;  %s37_s25 = int_to_ptr.vmem [resolvable:$true] %s36_s25 }
   0x5   :  { %s1694_s26 = scalar_lea.vmem %s37_s25, 8192  ;;  %p1699_p1 = scmp.lt.s32.totalorder %s37_s25, %s37_s25 }
   0x6   :  { %p1695_p0 = scmp.ne.s32.totalorder %s37_s25, %s1694_s26  ;;  %p1700_p2 = scmp.lt.s32.totalorder %s1694_s26, %s1694_s26 }
   0x8   :  { %p1701_p3 = por %p1700_p2, %p1699_p1 }
   0xa   :  { %p1702_p4 = pnand %p1701_p3, %p1695_p0 }
   0xc   :  { %1705 = shalt.err (!%p1702_p4)
}
   0xd   :  { %s1795_s27 = smov 128   ;;  %s1796_s28 = smov 8  }
   0xe   :  { %42 = dma.hbm_to_vmem [thread:$0]  %s2114_s2, 8192, %s37_s25, [#allocation6], %s1795_s27, %s1795_s27, %s1796_s28  }
   0xf   :  { %s1797_s8 = smov [#allocation2]  }
  0x10   :  { %s24_s9 = sshll.u32 %s1797_s8, 4  ;;  %s25_s9 = int_to_ptr.vmem [resolvable:$true] %s24_s9 }
  0x11   :  { %s1714_s10 = scalar_lea.vmem %s25_s9, 8192  ;;  %p1719_p6 = scmp.lt.s32.totalorder %s25_s9, %s25_s9 }
  0x12   :  { %p1715_p5 = scmp.ne.s32.totalorder %s25_s9, %s1714_s10  ;;  %p1720_p7 = scmp.lt.s32.totalorder %s1714_s10, %s1714_s10 }
  0x14   :  { %p1721_p8 = por %p1720_p7, %p1719_p6 }
  0x16   :  { %p1722_p9 = pnand %p1721_p8, %p1715_p5 }
  0x18   :  { %1725 = shalt.err (!%p1722_p9)
}
  0x19   :  { %s1798_s11 = smov 256   ;;  %s1799_s12 = smov 16  }
  0x1a   :  { %30 = dma.hbm_to_vmem [thread:$0]  %s2113_s1, 8192, %s25_s9, [#allocation3], %s1798_s11, %s1798_s11, %s1799_s12  }
  0x1b   :  { %s1800_s15 = smov [#allocation7]  }
  0x1c   :  { %s48_s16 = sshll.u32 %s1800_s15, 4  ;;  %s49_s16 = int_to_ptr.vmem [resolvable:$true] %s48_s16 }
  0x1d   :  { %s1734_s2 = scalar_lea.vmem %s49_s16, 8192  ;;  %p1739_p11 = scmp.lt.s32.totalorder %s49_s16, %s49_s16 }
  0x1e   :  { %p1735_p10 = scmp.ne.s32.totalorder %s49_s16, %s1734_s2  ;;  %p1740_p12 = scmp.lt.s32.totalorder %s1734_s2, %s1734_s2 }
  0x20   :  { %p1741_p13 = por %p1740_p12, %p1739_p11 }
  0x22   :  { %p1742_p0 = pnand %p1741_p13, %p1735_p10 }
  0x24   :  { %1745 = shalt.err (!%p1742_p0)
}
  0x25   :  { %54 = dma.hbm_to_vmem [thread:$0]  %s2115_s3, 8192, %s49_s16, [#allocation6], %s1795_s27, %s1795_s27, %s1796_s28  }
  0x26   :  { %1786 = dma.done.wait [#allocation3], 8192  }
  0x27   :  { %1787 = vsyncadd [#allocation3], 4294959104 }
  0x28   :  { %1788 = dma.done.wait [#allocation6], 16384  }
  0x29   :  { %1789 = vsyncadd [#allocation6], 4294950912  ;;  %v1801_v0 = vmov 0.0   ;;  %v114_v1 = vld [vmem:[#allocation2 + $0xf8] sm:$0xff]  ;;  %v113_v2 = vld [vmem:[#allocation2 + $0xf0] sm:$0xff]  ;;  %v78_v17 = vlaneseq  ;;  %vm1802_vm0 = vmmov 0  }
  0x2a   :  { %191 = vmatprep.mubr.f32.mxu0 %v1801_v0  ;;  %1375 = vmatprep.subr.mxu1 %v1801_v0  ;;  %v112_v3 = vld [vmem:[#allocation2 + $0xe8] sm:$0xff]  ;;  %v111_v4 = vld [vmem:[#allocation2 + $0xe0] sm:$0xff]  ;;  %v110_v5 = vld [vmem:[#allocation2 + $0xd8] sm:$0xff]  ;;  %s1803_s26 = smov [#allocation8]   ;;  %s1804_s28 = smov [#allocation9]  }
  0x2b   :  { %127 = vmatprep.subr.mxu0 %v114_v1  ;;  %v109_v6 = vld [vmem:[#allocation2 + $0xd0] sm:$0xff]  ;;  %v108_v7 = vld [vmem:[#allocation2 + $0xc8] sm:$0xff]  ;;  %v107_v8 = vld [vmem:[#allocation2 + $0xc0] sm:$0xff]  ;;  %v1857_v25 = vshrl.u32 %v78_v17, 7  ;;  %1407 = vmatprep.mubr.msk.f32.mxu1 %vm1802_vm0, %v1801_v0  ;;  %s1196_s27 = sshll.u32 %s1803_s26, 4  ;;  %s1206_s29 = sshll.u32 %s1804_s28, 4  ;;  %s1197_s27 = int_to_ptr.vmem [resolvable:$true] %s1196_s27  ;;  %s1207_s29 = int_to_ptr.vmem [resolvable:$true] %s1206_s29 }
  0x2c   :  { %128 = vmatpush1.msra.mxu0 %v113_v2  ;;  %v106_v9 = vld [vmem:[#allocation2 + $0xb8] sm:$0xff]  ;;  %v105_v10 = vld [vmem:[#allocation2 + $0xb0] sm:$0xff]  ;;  %v104_v11 = vld [vmem:[#allocation2 + $0xa8] sm:$0xff]  ;;  %s1746_s30 = scalar_lea.vmem %s1197_s27, 128  ;;  %p1751_p2 = scmp.lt.s32.totalorder %s1197_s27, %s1197_s27 }
  0x2d   :  { %129 = vmatprep.subr.mxu0 %v112_v3  ;;  %v103_v12 = vld [vmem:[#allocation2 + $0xa0] sm:$0xff]  ;;  %v102_v13 = vld [vmem:[#allocation2 + $0x98] sm:$0xff]  ;;  %v101_v14 = vld [vmem:[#allocation2 + $0x90] sm:$0xff]  ;;  %v1862_v32 = vsub.s32 0, %v1857_v25  ;;  %p1747_p1 = scmp.ne.s32.totalorder %s1197_s27, %s1746_s30  ;;  %p1752_p3 = scmp.lt.s32.totalorder %s1746_s30, %s1746_s30 }
  0x2e   :  { %130 = vmatpush1.msra.mxu0 %v111_v4  ;;  %v100_v15 = vld [vmem:[#allocation2 + $0x88] sm:$0xff]  ;;  %v99_v16 = vld [vmem:[#allocation2 + $0x80] sm:$0xff]  ;;  %v214_v18 = vld [vmem:[#allocation5 + $0x78] sm:$0xff] }
  0x2f   :  { %131 = vmatprep.subr.mxu0 %v110_v5  ;;  %v213_v19 = vld [vmem:[#allocation5 + $0x70] sm:$0xff]  ;;  %v98_v20 = vld [vmem:[#allocation2 + $0x78] sm:$0xff]  ;;  %1376 = vmatpush3.msra.mxu1 %v214_v18  ;;  %v212_v22 = vld [vmem:[#allocation5 + $0x68] sm:$0xff]  ;;  %p1753_p4 = por %p1752_p3, %p1751_p2 }
  0x30   :  { %132 = vmatpush1.msra.mxu0 %v109_v6  ;;  %v97_v21 = vld [vmem:[#allocation2 + $0x70] sm:$0xff]  ;;  %1377 = vmatprep.subr.mxu1 %v1801_v0  ;;  %v96_v23 = vld [vmem:[#allocation2 + $0x68] sm:$0xff]  ;;  %v95_v24 = vld [vmem:[#allocation2 + $0x60] sm:$0xff] }
  0x31   :  { %133 = vmatprep.subr.mxu0 %v108_v7  ;;  %1378 = vmatpush3.msra.mxu1 %v213_v19  ;;  %v211_v26 = vld [vmem:[#allocation5 + $0x60] sm:$0xff]  ;;  %v94_v27 = vld [vmem:[#allocation2 + $0x58] sm:$0xff]  ;;  %v93_v28 = vld [vmem:[#allocation2 + $0x50] sm:$0xff]  ;;  %p1754_p5 = pnand %p1753_p4, %p1747_p1 }
  0x32   :  { %134 = vmatpush1.msra.mxu0 %v107_v8  ;;  %1379 = vmatprep.subr.mxu1 %v1801_v0  ;;  %v210_v29 = vld [vmem:[#allocation5 + $0x58] sm:$0xff]  ;;  %v92_v30 = vld [vmem:[#allocation2 + $0x48] sm:$0xff]  ;;  %v91_v31 = vld [vmem:[#allocation2 + $0x40] sm:$0xff] }
  0x33   :  { %135 = vmatprep.subr.mxu0 %v106_v9  ;;  %1380 = vmatpush3.msra.mxu1 %v212_v22  ;;  %v209_v33 = vld [vmem:[#allocation5 + $0x50] sm:$0xff]  ;;  %v90_v34 = vld [vmem:[#allocation2 + $0x38] sm:$0xff]  ;;  %v1868_v35 = vld [vmem:[%s2116_s4] sm:$0x1] }
  0x34   :  { %136 = vmatpush1.msra.mxu0 %v105_v10  ;;  %1381 = vmatprep.subr.mxu1 %v1801_v0  ;;  %v89_v36 = vld [vmem:[#allocation2 + $0x30] sm:$0xff]  ;;  %v208_v37 = vld [vmem:[#allocation5 + $0x48] sm:$0xff]  ;;  %v87_v39 = vld [vmem:[#allocation2 + $0x20] sm:$0xff]  ;;  %v81_v40 = vrot.slane %v1868_v35, %v1862_v32  ;;  %v123_v10 = vsub.s32 1, %v1857_v25 }
  0x35   :  { %137 = vmatprep.subr.mxu0 %v104_v11  ;;  %1382 = vmatpush3.msra.mxu1 %v211_v26  ;;  %v88_v38 = vld [vmem:[#allocation2 + $0x28] sm:$0xff]  ;;  %v86_v41 = vld [vmem:[#allocation2 + $0x18] sm:$0xff]  ;;  %v1877_v42 = vld [vmem:[%s2112_s0] sm:$0xff] }
  0x36   :  { %138 = vmatpush1.msra.mxu0 %v103_v12  ;;  %1383 = vmatprep.subr.mxu1 %v1801_v0  ;;  %v85_v43 = vld [vmem:[#allocation2 + $0x10] sm:$0xff]  ;;  %v84_v44 = vld [vmem:[#allocation2 + $0x8] sm:$0xff]  ;;  %v83_v45 = vld [vmem:[#allocation2] sm:$0xff]  ;;  %v1881_v46 = vmul.f32 %v81_v40, %v1877_v42 }
  0x37   :  { %139 = vmatprep.subr.mxu0 %v102_v13  ;;  %1384 = vmatpush3.msra.mxu1 %v210_v29  ;;  %v307_v47 = vld [vmem:[#allocation5 + $0xf8] sm:$0xff]  ;;  %v306_v48 = vld [vmem:[#allocation5 + $0xf0] sm:$0xff]  ;;  %v305_v49 = vld [vmem:[#allocation5 + $0xe8] sm:$0xff] }
  0x38   :  { %140 = vmatpush1.msra.mxu0 %v101_v14  ;;  %1385 = vmatprep.subr.mxu1 %v1801_v0  ;;  %v304_v50 = vld [vmem:[#allocation5 + $0xe0] sm:$0xff]  ;;  %v303_v51 = vld [vmem:[#allocation5 + $0xd8] sm:$0xff]  ;;  %v302_v52 = vld [vmem:[#allocation5 + $0xd0] sm:$0xff] }
  0x39   :  { %141 = vmatprep.subr.mxu0 %v100_v15  ;;  %1386 = vmatpush3.msra.mxu1 %v209_v33  ;;  %v301_v53 = vld [vmem:[#allocation5 + $0xc8] sm:$0xff]  ;;  %v300_v54 = vld [vmem:[#allocation5 + $0xc0] sm:$0xff]  ;;  %v299_v55 = vld [vmem:[#allocation5 + $0xb8] sm:$0xff] }
  0x3a   :  { %142 = vmatpush1.msra.mxu0 %v99_v16  ;;  %1387 = vmatprep.subr.mxu1 %v1801_v0  ;;  %v298_v56 = vld [vmem:[#allocation5 + $0xb0] sm:$0xff]  ;;  %v297_v57 = vld [vmem:[#allocation5 + $0xa8] sm:$0xff]  ;;  %v296_v58 = vld [vmem:[#allocation5 + $0xa0] sm:$0xff] }
  0x3b   :  { %143 = vmatprep.subr.mxu0 %v98_v20  ;;  %1388 = vmatpush3.msra.mxu1 %v208_v37  ;;  %v207_v59 = vld [vmem:[#allocation5 + $0x40] sm:$0xff]  ;;  %v295_v60 = vld [vmem:[#allocation5 + $0x98] sm:$0xff]  ;;  %v294_v62 = vld [vmem:[#allocation5 + $0x90] sm:$0xff] }
  0x3c   :  { %144 = vmatpush1.msra.mxu0 %v97_v21  ;;  %1389 = vmatprep.subr.mxu1 %v1801_v0  ;;  %v206_v61 = vld [vmem:[#allocation5 + $0x38] sm:$0xff]  ;;  %v205_v63 = vld [vmem:[#allocation5 + $0x30] sm:$0xff]  ;;  %v293_v1 = vld [vmem:[#allocation5 + $0x88] sm:$0xff] }
  0x3d   :  { %145 = vmatprep.subr.mxu0 %v96_v23  ;;  %1390 = vmatpush3.msra.mxu1 %v207_v59  ;;  %v204_v2 = vld [vmem:[#allocation5 + $0x28] sm:$0xff]  ;;  %v292_v3 = vld [vmem:[#allocation5 + $0x80] sm:$0xff]  ;;  %v202_v5 = vld [vmem:[#allocation5 + $0x18] sm:$0xff] }
  0x3e   :  { %146 = vmatpush1.msra.mxu0 %v95_v24  ;;  %1391 = vmatprep.subr.mxu1 %v1801_v0  ;;  %v203_v4 = vld [vmem:[#allocation5 + $0x20] sm:$0xff]  ;;  %v201_v6 = vld [vmem:[#allocation5 + $0x10] sm:$0xff]  ;;  %v200_v7 = vld [vmem:[#allocation5 + $0x8] sm:$0xff] }
  0x3f   :  { %147 = vmatprep.subr.mxu0 %v94_v27  ;;  %1392 = vmatpush3.msra.mxu1 %v206_v61  ;;  %v199_v8 = vld [vmem:[#allocation5] sm:$0xff]  ;;  %v492_v18 = vld [vmem:[#allocation7 + $0xf8] sm:$0xff]  ;;  %v491_v19 = vld [vmem:[#allocation7 + $0xf0] sm:$0xff] }
  0x40   :  { %148 = vmatpush1.msra.mxu0 %v93_v28  ;;  %1393 = vmatprep.subr.mxu1 %v1801_v0  ;;  %v115_v9 = vld [vmem:[%s2117_s5] ss:$2 sm:$0x3]  ;;  %v490_v20 = vld [vmem:[#allocation7 + $0xe8] sm:$0xff]  ;;  %v488_v22 = vld [vmem:[#allocation7 + $0xd8] sm:$0xff] }
  0x41   :  { %149 = vmatprep.subr.mxu0 %v92_v30  ;;  %1394 = vmatpush3.msra.mxu1 %v205_v63  ;;  %v120_v11 = vrot.slane %v115_v9, %v1862_v32  ;;  %v124_v12 = vrot.slane %v115_v9, %v123_v10  ;;  %v489_v21 = vld [vmem:[#allocation7 + $0xe0] sm:$0xff]  ;;  %v487_v23 = vld [vmem:[#allocation7 + $0xd0] sm:$0xff]  ;;  %v399_v24 = vld [vmem:[#allocation7 + $0x78] sm:$0xff] }
  0x42   :  { %150 = vmatpush1.msra.mxu0 %v91_v31  ;;  %1395 = vmatprep.subr.mxu1 %v1801_v0  ;;  %v486_v27 = vld [vmem:[#allocation7 + $0xc8] sm:$0xff]  ;;  %v398_v28 = vld [vmem:[#allocation7 + $0x70] sm:$0xff]  ;;  %v485_v29 = vld [vmem:[#allocation7 + $0xc0] sm:$0xff] }
  0x43   :  { %151 = vmatprep.subr.mxu0 %v90_v34  ;;  %1396 = vmatpush3.msra.mxu1 %v204_v2  ;;  %v484_v30 = vld [vmem:[#allocation7 + $0xb8] sm:$0xff]  ;;  %v483_v31 = vld [vmem:[#allocation7 + $0xb0] sm:$0xff]  ;;  %v482_v33 = vld [vmem:[#allocation7 + $0xa8] sm:$0xff] }
  0x44   :  { %152 = vmatpush1.msra.mxu0 %v89_v36  ;;  %1397 = vmatprep.subr.mxu1 %v1801_v0  ;;  %v481_v34 = vld [vmem:[#allocation7 + $0xa0] sm:$0xff]  ;;  %v480_v36 = vld [vmem:[#allocation7 + $0x98] sm:$0xff]  ;;  %v397_v37 = vld [vmem:[#allocation7 + $0x68] sm:$0xff] }
  0x45   :  { %153 = vmatprep.subr.mxu0 %v88_v38  ;;  %1398 = vmatpush3.msra.mxu1 %v203_v4  ;;  %v479_v38 = vld [vmem:[#allocation7 + $0x90] sm:$0xff]  ;;  %v478_v40 = vld [vmem:[#allocation7 + $0x88] sm:$0xff]  ;;  %v1220_v61 = vld [vmem:[%s2117_s5 + $0x1] ss:$0 sm:$0xff] }
  0x46   :  { %154 = vmatpush1.msra.mxu0 %v87_v39  ;;  %1399 = vmatprep.subr.mxu1 %v1801_v0  ;;  %v396_v39 = vld [vmem:[#allocation7 + $0x60] sm:$0xff]  ;;  %v670_v4 = vld [vmem:[#allocation2 + $0x1f0] sm:$0xff]  ;;  %v665_v9 = vld [vmem:[#allocation2 + $0x1c8] sm:$0xff] }
  0x47   :  { %155 = vmatprep.subr.mxu0 %v86_v41  ;;  %1400 = vmatpush3.msra.mxu1 %v202_v5  ;;  %v395_v41 = vld [vmem:[#allocation7 + $0x58] sm:$0xff]  ;;  %v669_v5 = vld [vmem:[#allocation2 + $0x1e8] sm:$0xff]  ;;  %v1049_v25 = vld [vmem:[#allocation7 + $0x1e0] sm:$0xff] }
  0x48   :  { %156 = vmatpush1.msra.mxu0 %v85_v43  ;;  %1401 = vmatprep.subr.mxu1 %v1801_v0  ;;  %v477_v43 = vld [vmem:[#allocation7 + $0x80] sm:$0xff] }
  0x49   :  { %157 = vmatprep.subr.mxu0 %v84_v44  ;;  %1402 = vmatpush3.msra.mxu1 %v201_v6  ;;  %v394_v44 = vld [vmem:[#allocation7 + $0x50] sm:$0xff]  ;;  %v668_v6 = vld [vmem:[#allocation2 + $0x1e0] sm:$0xff] }
  0x4a   :  { %158 = vmatpush1.msra.mxu0 %v83_v45  ;;  %1403 = vmatprep.subr.mxu1 %v1801_v0  ;;  %v393_v45 = vld [vmem:[#allocation7 + $0x48] sm:$0xff] }
  0x4b   :  { %192 = vmatmul.mubr.f32.vlgmr.msra.gmra.mxu0 %v1881_v46  ;;  %1410 = vmatprep.subr.mxu0 %v1801_v0 }
  0x4c   :  { %1411 = vmatpush3.msra.mxu0 %v307_v47  ;;  %1442 = vmatprep.mubr.msk.f32.mxu0 %vm1802_vm0, %v1801_v0  ;;  %v392_v47 = vld [vmem:[#allocation7 + $0x40] sm:$0xff] }
  0x4d   :  { %1412 = vmatprep.subr.mxu0 %v1801_v0  ;;  %1404 = vmatpush3.msra.mxu1 %v200_v7  ;;  %v667_v7 = vld [vmem:[#allocation2 + $0x1d8] sm:$0xff] }
  0x4e   :  { %1413 = vmatpush3.msra.mxu0 %v306_v48  ;;  %1405 = vmatprep.subr.mxu1 %v1801_v0  ;;  %v391_v48 = vld [vmem:[#allocation7 + $0x38] sm:$0xff] }
  0x4f   :  { %1414 = vmatprep.subr.mxu0 %v1801_v0  ;;  %1406 = vmatpush3.msra.mxu1 %v199_v8  ;;  %v666_v8 = vld [vmem:[#allocation2 + $0x1d0] sm:$0xff] }
  0x50   :  { %1415 = vmatpush3.msra.mxu0 %v305_v49  ;;  %1445 = vmatprep.subr.mxu1 %v1801_v0  ;;  %v390_v49 = vld [vmem:[#allocation7 + $0x30] sm:$0xff] }
  0x51   :  { %1416 = vmatprep.subr.mxu0 %v1801_v0 }
  0x52   :  { %1417 = vmatpush3.msra.mxu0 %v304_v50  ;;  %v389_v50 = vld [vmem:[#allocation7 + $0x28] sm:$0xff] }
  0x53   :  { %1418 = vmatprep.subr.mxu0 %v1801_v0 }
  0x54   :  { %1419 = vmatpush3.msra.mxu0 %v303_v51  ;;  %v388_v51 = vld [vmem:[#allocation7 + $0x20] sm:$0xff] }
  0x55   :  { %1420 = vmatprep.subr.mxu0 %v1801_v0 }
  0x56   :  { %1421 = vmatpush3.msra.mxu0 %v302_v52  ;;  %v387_v52 = vld [vmem:[#allocation7 + $0x18] sm:$0xff] }
  0x57   :  { %1422 = vmatprep.subr.mxu0 %v1801_v0 }
  0x58   :  { %1423 = vmatpush3.msra.mxu0 %v301_v53  ;;  %v386_v53 = vld [vmem:[#allocation7 + $0x10] sm:$0xff] }
  0x59   :  { %1424 = vmatprep.subr.mxu0 %v1801_v0 }
  0x5a   :  { %1425 = vmatpush3.msra.mxu0 %v300_v54  ;;  %v385_v54 = vld [vmem:[#allocation7 + $0x8] sm:$0xff] }
  0x5b   :  { %1426 = vmatprep.subr.mxu0 %v1801_v0 }
  0x5c   :  { %1427 = vmatpush3.msra.mxu0 %v299_v55  ;;  %v384_v55 = vld [vmem:[#allocation7] sm:$0xff] }
  0x5d   :  { %1428 = vmatprep.subr.mxu0 %v1801_v0 }
  0x5e   :  { %1429 = vmatpush3.msra.mxu0 %v298_v56  ;;  %v1221_v56 = vld [vmem:[%s2117_s5 + $0x3] ss:$0 sm:$0xff] }
  0x5f   :  { %1430 = vmatprep.subr.mxu0 %v1801_v0 }
  0x60   :  { %1431 = vmatpush3.msra.mxu0 %v297_v57 }
  0x61   :  { %1432 = vmatprep.subr.mxu0 %v1801_v0 }
  0x62   :  { %1433 = vmatpush3.msra.mxu0 %v296_v58 }
  0x63   :  { %1434 = vmatprep.subr.mxu0 %v1801_v0 }
  0x64   :  { %1435 = vmatpush3.msra.mxu0 %v295_v60 }
  0x65   :  { %1436 = vmatprep.subr.mxu0 %v1801_v0 }
  0x66   :  { %1437 = vmatpush3.msra.mxu0 %v294_v62 }
  0x67   :  { %1438 = vmatprep.subr.mxu0 %v1801_v0 }
  0x68   :  { %1439 = vmatpush3.msra.mxu0 %v293_v1 }
  0x69   :  { %1440 = vmatprep.subr.mxu0 %v1801_v0 }
  0x6a   :  { %1441 = vmatpush3.msra.mxu0 %v292_v3  ;;  %v671_v3 = vld [vmem:[#allocation2 + $0x1f8] sm:$0xff] }
  0x6b   :  { %1480 = vmatprep.subr.mxu0 %v1801_v0 }
 0x10b   :  { %v193_v13 = vpop.f32.mrf.mxu0 }
 0x10c   :  { %v194_v14 = vadd.f32 %v193_v13, %v120_v11  ;;  %v664_v11 = vld [vmem:[#allocation2 + $0x1c0] sm:$0xff]  ;;  %v662_v13 = vld [vmem:[#allocation2 + $0x1b0] sm:$0xff] }
 0x10d   :  { %v195_v15 = vpop.f32.mrf.mxu0 }
 0x10e   :  { %1666 = vtanh.f32 %v194_v14  ;;  %v196_v16 = vadd.f32 %v195_v15, %v124_v12  ;;  %v663_v12 = vld [vmem:[#allocation2 + $0x1b8] sm:$0xff]  ;;  %v661_v14 = vld [vmem:[#allocation2 + $0x1a8] sm:$0xff]  ;;  %v660_v15 = vld [vmem:[#allocation2 + $0x1a0] sm:$0xff] }
 0x110   :  { %v290_v17 = vmax.f32 %v196_v16, 0.0  ;;  %v659_v16 = vld [vmem:[#allocation2 + $0x198] sm:$0xff] }
 0x112   :  { %1443 = vmatmul.mubr.f32.vlgmr.msra.gmra.mxu0 %v290_v17  ;;  %v658_v17 = vld [vmem:[#allocation2 + $0x190] sm:$0xff] }
 0x113   :  { %1481 = vmatpush3.msra.mxu0 %v492_v18  ;;  %1512 = vmatprep.mubr.msk.f32.mxu0 %vm1802_vm0, %v1801_v0  ;;  %v657_v18 = vld [vmem:[#allocation2 + $0x188] sm:$0xff] }
 0x114   :  { %1482 = vmatprep.subr.mxu0 %v1801_v0 }
 0x115   :  { %1483 = vmatpush3.msra.mxu0 %v491_v19  ;;  %v656_v19 = vld [vmem:[#allocation2 + $0x180] sm:$0xff] }
 0x116   :  { %1484 = vmatprep.subr.mxu0 %v1801_v0 }
 0x117   :  { %1485 = vmatpush3.msra.mxu0 %v490_v20  ;;  %v655_v20 = vld [vmem:[#allocation2 + $0x178] sm:$0xff] }
 0x118   :  { %1486 = vmatprep.subr.mxu0 %v1801_v0 }
 0x119   :  { %1487 = vmatpush3.msra.mxu0 %v489_v21  ;;  %v654_v21 = vld [vmem:[#allocation2 + $0x170] sm:$0xff] }
 0x11a   :  { %1488 = vmatprep.subr.mxu0 %v1801_v0 }
 0x11b   :  { %v1667_v26 = vpop.eup %1666  ;;  %1489 = vmatpush3.msra.mxu0 %v488_v22  ;;  %v653_v22 = vld [vmem:[#allocation2 + $0x168] sm:$0xff] }
 0x11c   :  { %1408 = vmatmul.mubr.f32.vlgmr.msra.gmra.mxu1 %v1667_v26  ;;  %1490 = vmatprep.subr.mxu0 %v1801_v0  ;;  %v650_v26 = vld [vmem:[#allocation2 + $0x150] sm:$0xff] }
 0x11d   :  { %1491 = vmatpush3.msra.mxu0 %v487_v23  ;;  %1446 = vmatpush3.msra.mxu1 %v399_v24  ;;  %v652_v23 = vld [vmem:[#allocation2 + $0x160] sm:$0xff]  ;;  %v651_v24 = vld [vmem:[#allocation2 + $0x158] sm:$0xff] }
 0x11e   :  { %1492 = vmatprep.subr.mxu0 %v1801_v0  ;;  %1447 = vmatprep.subr.mxu1 %v1801_v0 }
 0x11f   :  { %1493 = vmatpush3.msra.mxu0 %v486_v27  ;;  %1448 = vmatpush3.msra.mxu1 %v398_v28  ;;  %v649_v27 = vld [vmem:[#allocation2 + $0x148] sm:$0xff]  ;;  %v648_v28 = vld [vmem:[#allocation2 + $0x140] sm:$0xff] }
 0x120   :  { %1494 = vmatprep.subr.mxu0 %v1801_v0  ;;  %1449 = vmatprep.subr.mxu1 %v1801_v0 }
 0x121   :  { %1495 = vmatpush3.msra.mxu0 %v485_v29  ;;  %1477 = vmatprep.mubr.msk.f32.mxu1 %vm1802_vm0, %v1801_v0  ;;  %v647_v29 = vld [vmem:[#allocation2 + $0x138] sm:$0xff] }
 0x122   :  { %1496 = vmatprep.subr.mxu0 %v1801_v0  ;;  %1450 = vmatpush3.msra.mxu1 %v397_v37  ;;  %v641_v37 = vld [vmem:[#allocation2 + $0x108] sm:$0xff] }
 0x123   :  { %1497 = vmatpush3.msra.mxu0 %v484_v30  ;;  %1451 = vmatprep.subr.mxu1 %v1801_v0  ;;  %v646_v30 = vld [vmem:[#allocation2 + $0x130] sm:$0xff] }
 0x124   :  { %1498 = vmatprep.subr.mxu0 %v1801_v0  ;;  %1452 = vmatpush3.msra.mxu1 %v396_v39  ;;  %v773_v39 = vld [vmem:[#allocation5 + $0x178] sm:$0xff] }
 0x125   :  { %1499 = vmatpush3.msra.mxu0 %v483_v31  ;;  %1453 = vmatprep.subr.mxu1 %v1801_v0  ;;  %v645_v31 = vld [vmem:[#allocation2 + $0x128] sm:$0xff] }
 0x126   :  { %1500 = vmatprep.subr.mxu0 %v1801_v0  ;;  %1454 = vmatpush3.msra.mxu1 %v395_v41  ;;  %v771_v41 = vld [vmem:[#allocation5 + $0x168] sm:$0xff] }
 0x127   :  { %1501 = vmatpush3.msra.mxu0 %v482_v33  ;;  %1455 = vmatprep.subr.mxu1 %v1801_v0  ;;  %v644_v33 = vld [vmem:[#allocation2 + $0x120] sm:$0xff] }
 0x128   :  { %1502 = vmatprep.subr.mxu0 %v1801_v0  ;;  %1456 = vmatpush3.msra.mxu1 %v394_v44  ;;  %v769_v44 = vld [vmem:[#allocation5 + $0x158] sm:$0xff] }
 0x129   :  { %1503 = vmatpush3.msra.mxu0 %v481_v34  ;;  %1457 = vmatprep.subr.mxu1 %v1801_v0  ;;  %v643_v34 = vld [vmem:[#allocation2 + $0x118] sm:$0xff] }
 0x12a   :  { %1504 = vmatprep.subr.mxu0 %v1801_v0  ;;  %1458 = vmatpush3.msra.mxu1 %v393_v45  ;;  %v768_v45 = vld [vmem:[#allocation5 + $0x150] sm:$0xff] }
 0x12b   :  { %1505 = vmatpush3.msra.mxu0 %v480_v36  ;;  %1459 = vmatprep.subr.mxu1 %v1801_v0  ;;  %v642_v36 = vld [vmem:[#allocation2 + $0x110] sm:$0xff] }
 0x12c   :  { %1506 = vmatprep.subr.mxu0 %v1801_v0  ;;  %1460 = vmatpush3.msra.mxu1 %v392_v47  ;;  %v767_v47 = vld [vmem:[#allocation5 + $0x148] sm:$0xff] }
 0x12d   :  { %1507 = vmatpush3.msra.mxu0 %v479_v38  ;;  %1461 = vmatprep.subr.mxu1 %v1801_v0  ;;  %v640_v38 = vld [vmem:[#allocation2 + $0x100] sm:$0xff] }
 0x12e   :  { %1508 = vmatprep.subr.mxu0 %v1801_v0  ;;  %1462 = vmatpush3.msra.mxu1 %v391_v48 }
 0x12f   :  { %1509 = vmatpush3.msra.mxu0 %v478_v40  ;;  %1463 = vmatprep.subr.mxu1 %v1801_v0  ;;  %v772_v40 = vld [vmem:[#allocation5 + $0x170] sm:$0xff] }
 0x130   :  { %1510 = vmatprep.subr.mxu0 %v1801_v0  ;;  %1464 = vmatpush3.msra.mxu1 %v390_v49 }
 0x131   :  { %1511 = vmatpush3.msra.mxu0 %v477_v43  ;;  %1465 = vmatprep.subr.mxu1 %v1801_v0  ;;  %v770_v43 = vld [vmem:[#allocation5 + $0x160] sm:$0xff] }
 0x132   :  { %1515 = vmatprep.subr.mxu0 %v1801_v0  ;;  %1466 = vmatpush3.msra.mxu1 %v389_v50  ;;  %v77_v50 = vsub.f32 1.0, %v1868_v35 }
 0x133   :  { %1467 = vmatprep.subr.mxu1 %v1801_v0 }
 0x134   :  { %1468 = vmatpush3.msra.mxu1 %v388_v51  ;;  %v579_v51 = vsub.f32 0.0, %v77_v50 }
 0x135   :  { %1469 = vmatprep.subr.mxu1 %v1801_v0 }
 0x136   :  { %1470 = vmatpush3.msra.mxu1 %v387_v52  ;;  %v1222_v52 = vld [vmem:[%s2116_s4 + $0x4] ss:$0 sm:$0xff] }
 0x137   :  { %1471 = vmatprep.subr.mxu1 %v1801_v0 }
 0x138   :  { %1472 = vmatpush3.msra.mxu1 %v386_v53  ;;  %v583_v53 = vrot.slane %v579_v51, %v1862_v32  ;;  %v857_v51 = vld [vmem:[#allocation5 + $0x1b0] sm:$0xff] }
 0x139   :  { %1473 = vmatprep.subr.mxu1 %v1801_v0 }
 0x13a   :  { %1474 = vmatpush3.msra.mxu1 %v385_v54 }
 0x13b   :  { %1475 = vmatprep.subr.mxu1 %v1801_v0 }
 0x13c   :  { %1476 = vmatpush3.msra.mxu1 %v384_v55 }
 0x13d   :  { %685 = vmatprep.subr.mxu1 %v671_v3 }
 0x1d2   :  { %v379_v57 = vpop.f32.mrf.mxu0 }
 0x1d3   :  { %v380_v58 = vadd.f32 %v1221_v56, %v379_v57 }
 0x1d4   :  { %v1444_v59 = vpop.f32.mrf.mxu0 }
 0x1d5   :  { %v475_v60 = vmax.f32 %v380_v58, 0.0 }
 0x1d7   :  { %1513 = vmatmul.mubr.f32.vlgmr.msra.gmra.mxu0 %v475_v60  ;;  %v1223_v60 = vld [vmem:[%s2116_s4 + $0x5] ss:$0 sm:$0xff] }
 0x1d8   :  { %1547 = vmatprep.mubr.msk.f32.mxu0 %vm1802_vm0, %v1801_v0  ;;  %1516 = vmatpush3.msra.mxu0 %v773_v39  ;;  %v866_v39 = vld [vmem:[#allocation5 + $0x1f8] sm:$0xff] }
 0x1d9   :  { %1517 = vmatprep.subr.mxu0 %v1801_v0 }
 0x1da   :  { %1518 = vmatpush3.msra.mxu0 %v772_v40 }
 0x1db   :  { %1519 = vmatprep.subr.mxu0 %v1801_v0 }
 0x1dc   :  { %v286_v62 = vpop.f32.mrf.mxu1  ;;  %1520 = vmatpush3.msra.mxu0 %v771_v41  ;;  %v865_v41 = vld [vmem:[#allocation5 + $0x1f0] sm:$0xff] }
 0x1dd   :  { %v287_v63 = vadd.f32 %v1220_v61, %v286_v62  ;;  %1521 = vmatprep.subr.mxu0 %v1801_v0  ;;  %v572_v62 = vrot.slane %v77_v50, %v1862_v32  ;;  %v858_v50 = vld [vmem:[#allocation5 + $0x1b8] sm:$0xff] }
 0x1de   :  { %v1409_v1 = vpop.f32.mrf.mxu1  ;;  %1522 = vmatpush3.msra.mxu0 %v770_v43  ;;  %v864_v43 = vld [vmem:[#allocation5 + $0x1e8] sm:$0xff] }
 0x1df   :  { %1668 = vtanh.f32 %v287_v63  ;;  %1523 = vmatprep.subr.mxu0 %v1801_v0 }
 0x1e0   :  { %1524 = vmatpush3.msra.mxu0 %v769_v44  ;;  %v863_v44 = vld [vmem:[#allocation5 + $0x1e0] sm:$0xff] }
 0x1e1   :  { %1525 = vmatprep.subr.mxu0 %v1801_v0 }
 0x1e2   :  { %1526 = vmatpush3.msra.mxu0 %v768_v45  ;;  %v862_v45 = vld [vmem:[#allocation5 + $0x1d8] sm:$0xff] }
 0x1e3   :  { %1527 = vmatprep.subr.mxu0 %v1801_v0 }
 0x1e4   :  { %1528 = vmatpush3.msra.mxu0 %v767_v47  ;;  %v861_v47 = vld [vmem:[#allocation5 + $0x1d0] sm:$0xff] }
 0x1e5   :  { %1529 = vmatprep.subr.mxu0 %v1801_v0 }
 0x1ec   :  { %v1669_v2 = vpop.eup %1668 }
 0x1ed   :  { %1478 = vmatmul.mubr.f32.vlgmr.msra.gmra.mxu1 %v1669_v2 }
 0x1ee   :  { %749 = vmatprep.mubr.f32.mxu1 %v1801_v0  ;;  %686 = vmatpush1.msra.mxu1 %v670_v4 }
 0x1ef   :  { %687 = vmatprep.subr.mxu1 %v669_v5 }
 0x1f0   :  { %688 = vmatpush1.msra.mxu1 %v668_v6 }
 0x1f1   :  { %689 = vmatprep.subr.mxu1 %v667_v7 }
 0x1f2   :  { %690 = vmatpush1.msra.mxu1 %v666_v8 }
 0x1f3   :  { %691 = vmatprep.subr.mxu1 %v665_v9 }
 0x1f4   :  { %692 = vmatpush1.msra.mxu1 %v664_v11 }
 0x1f5   :  { %693 = vmatprep.subr.mxu1 %v663_v12 }
 0x1f6   :  { %694 = vmatpush1.msra.mxu1 %v662_v13 }
 0x1f7   :  { %695 = vmatprep.subr.mxu1 %v661_v14 }
 0x1f8   :  { %696 = vmatpush1.msra.mxu1 %v660_v15 }
 0x1f9   :  { %697 = vmatprep.subr.mxu1 %v659_v16 }
 0x1fa   :  { %698 = vmatpush1.msra.mxu1 %v658_v17 }
 0x1fb   :  { %699 = vmatprep.subr.mxu1 %v657_v18 }
 0x1fc   :  { %700 = vmatpush1.msra.mxu1 %v656_v19 }
 0x1fd   :  { %701 = vmatprep.subr.mxu1 %v655_v20 }
 0x1fe   :  { %702 = vmatpush1.msra.mxu1 %v654_v21 }
 0x1ff   :  { %703 = vmatprep.subr.mxu1 %v653_v22 }
 0x200   :  { %704 = vmatpush1.msra.mxu1 %v652_v23 }
 0x201   :  { %705 = vmatprep.subr.mxu1 %v651_v24 }
 0x202   :  { %706 = vmatpush1.msra.mxu1 %v650_v26  ;;  %v1990_v26 = vld [vmem:[%s2116_s4 + $0x8] sm:$0x1] }
 0x203   :  { %707 = vmatprep.subr.mxu1 %v649_v27 }
 0x204   :  { %708 = vmatpush1.msra.mxu1 %v648_v28  ;;  %v616_v28 = vld [vmem:[%s2116_s4 + $0x2] sm:$0x1] }
 0x205   :  { %709 = vmatprep.subr.mxu1 %v647_v29  ;;  %v1224_v29 = vld [vmem:[%s2116_s4 + $0x3] ss:$0 sm:$0xff] }
 0x206   :  { %710 = vmatpush1.msra.mxu1 %v646_v30 }
 0x207   :  { %711 = vmatprep.subr.mxu1 %v645_v31 }
 0x208   :  { %712 = vmatpush1.msra.mxu1 %v644_v33  ;;  %v637_v33 = vrot.slane %v1990_v26, %v1862_v32 }
 0x209   :  { %713 = vmatprep.subr.mxu1 %v643_v34 }
 0x20a   :  { %714 = vmatpush1.msra.mxu1 %v642_v36 }
 0x20b   :  { %715 = vmatprep.subr.mxu1 %v641_v37 }
 0x20c   :  { %716 = vmatpush1.msra.mxu1 %v640_v38 }
 0x20d   :  { %1550 = vmatprep.subr.mxu1 %v1801_v0 }
 0x297   :  { %v564_v48 = vpop.f32.mrf.mxu0 }
 0x298   :  { %v565_v61 = vadd.f32 %v1223_v60, %v564_v48  ;;  %v860_v48 = vld [vmem:[#allocation5 + $0x1c8] sm:$0xff] }
 0x299   :  { %v1514_v49 = vpop.f32.mrf.mxu0  ;;  %v763_v60 = vld [vmem:[#allocation5 + $0x128] sm:$0xff] }
 0x29a   :  { %v568_v35 = vsub.f32 %v1877_v42, %v565_v61  ;;  %v859_v49 = vld [vmem:[#allocation5 + $0x1c0] sm:$0xff] }
 0x29b   :  { %v851_v61 = vld [vmem:[#allocation5 + $0x180] sm:$0xff] }
 0x29c   :  { %v573_v63 = vmul.f32 %v572_v62, %v568_v35  ;;  %v762_v35 = vld [vmem:[#allocation5 + $0x120] sm:$0xff]  ;;  %v761_v62 = vld [vmem:[#allocation5 + $0x118] sm:$0xff] }
 0x2ad   :  { %v471_v54 = vpop.f32.mrf.mxu1 }
 0x2ae   :  { %v472_v55 = vadd.f32 %v1222_v52, %v471_v54  ;;  %v856_v52 = vld [vmem:[#allocation5 + $0x1a8] sm:$0xff]  ;;  %v766_v54 = vld [vmem:[#allocation5 + $0x140] sm:$0xff] }
 0x2af   :  { %v1479_v56 = vpop.f32.mrf.mxu1  ;;  %1530 = vmatpush3.msra.mxu0 %v766_v54 }
 0x2b0   :  { %v574_v57 = vsub.f32 0.0, %v472_v55  ;;  %v584_v58 = vmul.f32 %v583_v53, %v472_v55  ;;  %v855_v53 = vld [vmem:[#allocation5 + $0x1a0] sm:$0xff]  ;;  %v854_v55 = vld [vmem:[#allocation5 + $0x198] sm:$0xff]  ;;  %1531 = vmatprep.subr.mxu0 %v1801_v0 }
 0x2b1   :  { %v765_v56 = vld [vmem:[#allocation5 + $0x138] sm:$0xff] }
 0x2b2   :  { %v575_v59 = vmul.f32 1.442695, %v574_v57  ;;  %v853_v57 = vld [vmem:[#allocation5 + $0x190] sm:$0xff]  ;;  %1532 = vmatpush3.msra.mxu0 %v765_v56 }
 0x2b3   :  { %1533 = vmatprep.subr.mxu0 %v1801_v0 }
 0x2b4   :  { %1670 = vpow2.f32 %v575_v59  ;;  %v852_v59 = vld [vmem:[#allocation5 + $0x188] sm:$0xff] }
 0x2c1   :  { %v1671_v1 = vpop.eup %1670 }
 0x2c2   :  { %v577_v2 = vmul.f32 %v1671_v1, %v573_v63  ;;  %v760_v63 = vld [vmem:[#allocation5 + $0x110] sm:$0xff]  ;;  %v759_v1 = vld [vmem:[#allocation5 + $0x108] sm:$0xff] }
 0x2c4   :  { %v578_v3 = vadd.f32 %v577_v2, %v1881_v46  ;;  %v603_v46 = vld [vmem:[%s2116_s4 + $0x1] sm:$0x1] }
 0x2c5   :  { %v758_v2 = vld [vmem:[#allocation5 + $0x100] sm:$0xff] }
 0x2c6   :  { %v585_v4 = vrot.slane %v578_v3, 4 }
 0x2c8   :  { %v586_v5 = vadd.f32 %v585_v4, %v578_v3 }
 0x2ca   :  { %v587_v6 = vrot.slane %v586_v5, 2 }
 0x2cc   :  { %v588_v7 = vadd.f32 %v587_v6, %v586_v5 }
 0x2ce   :  { %v589_v8 = vrot.slane %v588_v7, 1 }
 0x2d0   :  { %v590_v9 = vadd.f32 %v589_v8, %v588_v7 }
 0x2d2   :  { %v591_v11 = vmul.f32 0.125, %v590_v9 }
 0x2d4   :  { %v592_v12 = vsub.f32 %v578_v3, %v591_v11  ;;  %v1226_v3 = vld [vmem:[%s2117_s5 + $0x4] ss:$2 sm:$0x3] }
 0x2d5   :  { %v678_v4 = vrot.slane %v1226_v3, %v1862_v32  ;;  %v682_v5 = vrot.slane %v1226_v3, %v123_v10  ;;  %v1048_v10 = vld [vmem:[#allocation7 + $0x1d8] sm:$0xff]  ;;  %v1234_v3 = vld [vmem:[%s2116_s4 + $0xd] ss:$0 sm:$0xff] }
 0x2d6   :  { %v593_v13 = vmul.f32 %v592_v12, %v592_v12 }
 0x2d8   :  { %v594_v14 = vrot.slane %v593_v13, 4 }
 0x2da   :  { %v595_v15 = vadd.f32 %v594_v14, %v593_v13  ;;  %v1051_v13 = vld [vmem:[#allocation7 + $0x1f0] sm:$0xff]  ;;  %v1050_v14 = vld [vmem:[#allocation7 + $0x1e8] sm:$0xff] }
 0x2dc   :  { %v596_v16 = vrot.slane %v595_v15, 2 }
 0x2de   :  { %v597_v42 = vadd.f32 %v596_v16, %v595_v15  ;;  %v1047_v15 = vld [vmem:[#allocation7 + $0x1d0] sm:$0xff]  ;;  %v959_v16 = vld [vmem:[#allocation7 + $0x178] sm:$0xff] }
 0x2e0   :  { %v598_v17 = vrot.slane %v597_v42, 1 }
 0x2e2   :  { %v599_v18 = vadd.f32 %v598_v17, %v597_v42  ;;  %v1046_v17 = vld [vmem:[#allocation7 + $0x1c8] sm:$0xff] }
 0x2e4   :  { %v600_v19 = vmul.f32 0.14285715, %v599_v18  ;;  %v958_v18 = vld [vmem:[#allocation7 + $0x170] sm:$0xff] }
 0x2e6   :  { %v601_v20 = vadd.f32 1e-05, %v600_v19  ;;  %v1045_v19 = vld [vmem:[#allocation7 + $0x1c0] sm:$0xff] }
 0x2e8   :  { %1672 = vrsqrt.f32 %v601_v20 }
 0x2e9   :  { %1674 = vlog2.f32 %v601_v20  ;;  %v1044_v20 = vld [vmem:[#allocation7 + $0x1b8] sm:$0xff] }
 0x2f5   :  { %v1673_v21 = vpop.eup %1672 }
 0x2f6   :  { %v1675_v22 = vpop.eup %1674  ;;  %v604_v23 = vmul.f32 %v1673_v21, %v603_v46  ;;  %v1043_v46 = vld [vmem:[#allocation7 + $0x1b0] sm:$0xff]  ;;  %v1042_v21 = vld [vmem:[#allocation7 + $0x1a8] sm:$0xff] }
 0x2f7   :  { %v618_v24 = vmul.f32 0.6931472, %v1675_v22  ;;  %v1041_v22 = vld [vmem:[#allocation7 + $0x1a0] sm:$0xff] }
 0x2f8   :  { %v608_v27 = vrot.slane %v604_v23, %v1862_v32  ;;  %v1040_v23 = vld [vmem:[#allocation7 + $0x198] sm:$0xff] }
 0x2f9   :  { %v619_v30 = vmul.f32 0.5, %v618_v24  ;;  %v957_v24 = vld [vmem:[#allocation7 + $0x168] sm:$0xff] }
 0x2fa   :  { %v609_v31 = vmul.f32 %v608_v27, %v592_v12  ;;  %v1052_v12 = vld [vmem:[#allocation7 + $0x1f8] sm:$0xff]  ;;  %v1039_v27 = vld [vmem:[#allocation7 + $0x190] sm:$0xff] }
 0x2fb   :  { %v620_v34 = vsub.f32 %v616_v28, %v619_v30  ;;  %v956_v28 = vld [vmem:[#allocation7 + $0x160] sm:$0xff]  ;;  %v955_v30 = vld [vmem:[#allocation7 + $0x158] sm:$0xff] }
 0x2fc   :  { %v2001_v36 = vadd.f32 %v1224_v29, %v609_v31  ;;  %v1038_v29 = vld [vmem:[#allocation7 + $0x188] sm:$0xff]  ;;  %v1037_v31 = vld [vmem:[#allocation7 + $0x180] sm:$0xff] }
 0x2fd   :  { %v624_v37 = vrot.slane %v620_v34, %v1862_v32  ;;  %v953_v34 = vld [vmem:[#allocation7 + $0x148] sm:$0xff] }
 0x2fe   :  { %v2005_v38 = vmul.f32 %v637_v33, %v2001_v36  ;;  %v954_v33 = vld [vmem:[#allocation7 + $0x150] sm:$0xff] }
 0x2ff   :  { %v2007_v40 = vadd.f32 %v624_v37, %v584_v58  ;;  %v764_v58 = vld [vmem:[#allocation5 + $0x130] sm:$0xff]  ;;  %v952_v37 = vld [vmem:[#allocation7 + $0x140] sm:$0xff] }
 0x300   :  { %750 = vmatmul.mubr.f32.vlgmr.msra.gmra.mxu1 %v2005_v38  ;;  %1534 = vmatpush3.msra.mxu0 %v764_v58 }
 0x301   :  { %1551 = vmatpush3.msra.mxu1 %v866_v39  ;;  %1582 = vmatprep.mubr.msk.f32.mxu1 %vm1802_vm0, %v1801_v0  ;;  %v951_v39 = vld [vmem:[#allocation7 + $0x138] sm:$0xff] }
 0x302   :  { %1552 = vmatprep.subr.mxu1 %v1801_v0  ;;  %1535 = vmatprep.subr.mxu0 %v1801_v0 }
 0x303   :  { %1553 = vmatpush3.msra.mxu1 %v865_v41  ;;  %1536 = vmatpush3.msra.mxu0 %v763_v60  ;;  %v950_v41 = vld [vmem:[#allocation7 + $0x130] sm:$0xff] }
 0x304   :  { %1554 = vmatprep.subr.mxu1 %v1801_v0  ;;  %1537 = vmatprep.subr.mxu0 %v1801_v0 }
 0x305   :  { %1555 = vmatpush3.msra.mxu1 %v864_v43  ;;  %1538 = vmatpush3.msra.mxu0 %v762_v35  ;;  %v949_v43 = vld [vmem:[#allocation7 + $0x128] sm:$0xff] }
 0x306   :  { %1556 = vmatprep.subr.mxu1 %v1801_v0  ;;  %1539 = vmatprep.subr.mxu0 %v1801_v0 }
 0x307   :  { %1557 = vmatpush3.msra.mxu1 %v863_v44  ;;  %1540 = vmatpush3.msra.mxu0 %v761_v62  ;;  %v948_v44 = vld [vmem:[#allocation7 + $0x120] sm:$0xff] }
 0x308   :  { %1558 = vmatprep.subr.mxu1 %v1801_v0  ;;  %1541 = vmatprep.subr.mxu0 %v1801_v0 }
 0x309   :  { %1559 = vmatpush3.msra.mxu1 %v862_v45  ;;  %1542 = vmatpush3.msra.mxu0 %v760_v63  ;;  %v947_v45 = vld [vmem:[#allocation7 + $0x118] sm:$0xff] }
 0x30a   :  { %1560 = vmatprep.subr.mxu1 %v1801_v0  ;;  %1543 = vmatprep.subr.mxu0 %v1801_v0 }
 0x30b   :  { %1561 = vmatpush3.msra.mxu1 %v861_v47  ;;  %1544 = vmatpush3.msra.mxu0 %v759_v1  ;;  %v946_v47 = vld [vmem:[#allocation7 + $0x110] sm:$0xff] }
 0x30c   :  { %1562 = vmatprep.subr.mxu1 %v1801_v0  ;;  %1545 = vmatprep.subr.mxu0 %v1801_v0 }
 0x30d   :  { %1563 = vmatpush3.msra.mxu1 %v860_v48  ;;  %1546 = vmatpush3.msra.mxu0 %v758_v2  ;;  %v945_v48 = vld [vmem:[#allocation7 + $0x108] sm:$0xff] }
 0x30e   :  { %1564 = vmatprep.subr.mxu1 %v1801_v0  ;;  %1585 = vmatprep.subr.mxu0 %v1801_v0 }
 0x30f   :  { %1565 = vmatpush3.msra.mxu1 %v859_v49  ;;  %v944_v49 = vld [vmem:[#allocation7 + $0x100] sm:$0xff] }
 0x310   :  { %1566 = vmatprep.subr.mxu1 %v1801_v0 }
 0x311   :  { %1567 = vmatpush3.msra.mxu1 %v858_v50  ;;  %v1230_v50 = vld [vmem:[%s2117_s5 + $0x7] ss:$0 sm:$0xff] }
 0x312   :  { %1568 = vmatprep.subr.mxu1 %v1801_v0 }
 0x313   :  { %1569 = vmatpush3.msra.mxu1 %v857_v51 }
 0x314   :  { %1570 = vmatprep.subr.mxu1 %v1801_v0 }
 0x315   :  { %1571 = vmatpush3.msra.mxu1 %v856_v52 }
 0x316   :  { %1572 = vmatprep.subr.mxu1 %v1801_v0 }
 0x317   :  { %1573 = vmatpush3.msra.mxu1 %v855_v53 }
 0x318   :  { %1574 = vmatprep.subr.mxu1 %v1801_v0 }
 0x319   :  { %1575 = vmatpush3.msra.mxu1 %v854_v55  ;;  %v1228_v55 = vld [vmem:[%s2117_s5 + $0x5] ss:$0 sm:$0xff] }
 0x31a   :  { %1576 = vmatprep.subr.mxu1 %v1801_v0 }
 0x31b   :  { %1577 = vmatpush3.msra.mxu1 %v853_v57 }
 0x31c   :  { %1578 = vmatprep.subr.mxu1 %v1801_v0 }
 0x31d   :  { %1579 = vmatpush3.msra.mxu1 %v852_v59 }
 0x31e   :  { %1580 = vmatprep.subr.mxu1 %v1801_v0 }
 0x31f   :  { %1581 = vmatpush3.msra.mxu1 %v851_v61  ;;  %v1232_v61 = vld [vmem:[%s2116_s4 + $0xc] ss:$0 sm:$0xff] }
 0x320   :  { %1620 = vmatprep.subr.mxu1 %v1801_v0 }
 0x3c0   :  { %v751_v6 = vpop.f32.mrf.mxu1 }
 0x3c1   :  { %v752_v7 = vadd.f32 %v751_v6, %v678_v4  ;;  %v633_v4 = vsub.f32 1.0, %v1990_v26 }
 0x3c2   :  { %v753_v8 = vpop.f32.mrf.mxu1 }
 0x3c3   :  { %1676 = vtanh.f32 %v752_v7  ;;  %v754_v9 = vadd.f32 %v753_v8, %v682_v5  ;;  %v1132_v7 = vrot.slane %v633_v4, %v1862_v32 }
 0x3c5   :  { %v849_v11 = vmax.f32 %v754_v9, 0.0 }
 0x3c7   :  { %1583 = vmatmul.mubr.f32.vlgmr.msra.gmra.mxu1 %v849_v11 }
 0x3c8   :  { %1621 = vmatpush3.msra.mxu1 %v1052_v12  ;;  %1652 = vmatprep.mubr.msk.f32.mxu1 %vm1802_vm0, %v1801_v0 }
 0x3c9   :  { %1622 = vmatprep.subr.mxu1 %v1801_v0 }
 0x3ca   :  { %1623 = vmatpush3.msra.mxu1 %v1051_v13 }
 0x3cb   :  { %1624 = vmatprep.subr.mxu1 %v1801_v0 }
 0x3cc   :  { %1625 = vmatpush3.msra.mxu1 %v1050_v14 }
 0x3cd   :  { %1626 = vmatprep.subr.mxu1 %v1801_v0 }
 0x3ce   :  { %1627 = vmatpush3.msra.mxu1 %v1049_v25 }
 0x3cf   :  { %1628 = vmatprep.subr.mxu1 %v1801_v0 }
 0x3d0   :  { %v1677_v42 = vpop.eup %1676  ;;  %1629 = vmatpush3.msra.mxu1 %v1048_v10 }
 0x3d1   :  { %1548 = vmatmul.mubr.f32.vlgmr.msra.gmra.mxu0 %v1677_v42  ;;  %1630 = vmatprep.subr.mxu1 %v1801_v0 }
 0x3d2   :  { %1631 = vmatpush3.msra.mxu1 %v1047_v15  ;;  %1586 = vmatpush3.msra.mxu0 %v959_v16 }
 0x3d3   :  { %1632 = vmatprep.subr.mxu1 %v1801_v0  ;;  %1587 = vmatprep.subr.mxu0 %v1801_v0 }
 0x3d4   :  { %1633 = vmatpush3.msra.mxu1 %v1046_v17  ;;  %1588 = vmatpush3.msra.mxu0 %v958_v18 }
 0x3d5   :  { %1634 = vmatprep.subr.mxu1 %v1801_v0  ;;  %1589 = vmatprep.subr.mxu0 %v1801_v0 }
 0x3d6   :  { %1635 = vmatpush3.msra.mxu1 %v1045_v19  ;;  %1617 = vmatprep.mubr.msk.f32.mxu0 %vm1802_vm0, %v1801_v0 }
 0x3d7   :  { %1636 = vmatprep.subr.mxu1 %v1801_v0  ;;  %1590 = vmatpush3.msra.mxu0 %v957_v24 }
 0x3d8   :  { %1637 = vmatpush3.msra.mxu1 %v1044_v20  ;;  %1591 = vmatprep.subr.mxu0 %v1801_v0 }
 0x3d9   :  { %1638 = vmatprep.subr.mxu1 %v1801_v0  ;;  %1592 = vmatpush3.msra.mxu0 %v956_v28 }
 0x3da   :  { %1639 = vmatpush3.msra.mxu1 %v1043_v46  ;;  %1593 = vmatprep.subr.mxu0 %v1801_v0 }
 0x3db   :  { %1640 = vmatprep.subr.mxu1 %v1801_v0  ;;  %1594 = vmatpush3.msra.mxu0 %v955_v30 }
 0x3dc   :  { %1641 = vmatpush3.msra.mxu1 %v1042_v21  ;;  %1595 = vmatprep.subr.mxu0 %v1801_v0 }
 0x3dd   :  { %1642 = vmatprep.subr.mxu1 %v1801_v0  ;;  %1596 = vmatpush3.msra.mxu0 %v954_v33 }
 0x3de   :  { %1643 = vmatpush3.msra.mxu1 %v1041_v22  ;;  %1597 = vmatprep.subr.mxu0 %v1801_v0 }
 0x3df   :  { %1644 = vmatprep.subr.mxu1 %v1801_v0  ;;  %1598 = vmatpush3.msra.mxu0 %v953_v34 }
 0x3e0   :  { %1645 = vmatpush3.msra.mxu1 %v1040_v23  ;;  %1599 = vmatprep.subr.mxu0 %v1801_v0 }
 0x3e1   :  { %1646 = vmatprep.subr.mxu1 %v1801_v0  ;;  %1600 = vmatpush3.msra.mxu0 %v952_v37 }
 0x3e2   :  { %1647 = vmatpush3.msra.mxu1 %v1039_v27  ;;  %1601 = vmatprep.subr.mxu0 %v1801_v0  ;;  %v1139_v27 = vsub.f32 0.0, %v633_v4 }
 0x3e3   :  { %1648 = vmatprep.subr.mxu1 %v1801_v0  ;;  %1602 = vmatpush3.msra.mxu0 %v951_v39  ;;  %v1237_v39 = vld [vmem:[%s2116_s4 + $0xb] ss:$0 sm:$0xff] }
 0x3e4   :  { %1649 = vmatpush3.msra.mxu1 %v1038_v29  ;;  %1603 = vmatprep.subr.mxu0 %v1801_v0  ;;  %v1143_v34 = vrot.slane %v1139_v27, %v1862_v32 }
 0x3e5   :  { %1650 = vmatprep.subr.mxu1 %v1801_v0  ;;  %1604 = vmatpush3.msra.mxu0 %v950_v41 }
 0x3e6   :  { %1651 = vmatpush3.msra.mxu1 %v1037_v31  ;;  %1605 = vmatprep.subr.mxu0 %v1801_v0  ;;  %v1238_v31 = vld [vmem:[%s2116_s4 + $0xa] sm:$0x1] }
 0x3e7   :  { %1606 = vmatpush3.msra.mxu0 %v949_v43 }
 0x3e8   :  { %1607 = vmatprep.subr.mxu0 %v1801_v0 }
 0x3e9   :  { %1608 = vmatpush3.msra.mxu0 %v948_v44 }
 0x3ea   :  { %1609 = vmatprep.subr.mxu0 %v1801_v0 }
 0x3eb   :  { %1610 = vmatpush3.msra.mxu0 %v947_v45 }
 0x3ec   :  { %1611 = vmatprep.subr.mxu0 %v1801_v0 }
 0x3ed   :  { %1612 = vmatpush3.msra.mxu0 %v946_v47 }
 0x3ee   :  { %1613 = vmatprep.subr.mxu0 %v1801_v0 }
 0x3ef   :  { %1614 = vmatpush3.msra.mxu0 %v945_v48 }
 0x3f0   :  { %1615 = vmatprep.subr.mxu0 %v1801_v0 }
 0x3f1   :  { %1616 = vmatpush3.msra.mxu0 %v944_v49 }
 0x487   :  { %v938_v51 = vpop.f32.mrf.mxu1 }
 0x488   :  { %v939_v52 = vadd.f32 %v1230_v50, %v938_v51 }
 0x489   :  { %v1584_v53 = vpop.f32.mrf.mxu1 }
 0x48a   :  { %v1035_v54 = vmax.f32 %v939_v52, 0.0 }
 0x48c   :  { %1653 = vmatmul.mubr.f32.vlgmr.msra.gmra.mxu1 %v1035_v54 }
 0x491   :  { %v845_v56 = vpop.f32.mrf.mxu0 }
 0x492   :  { %v846_v57 = vadd.f32 %v1228_v55, %v845_v56 }
 0x493   :  { %v1549_v58 = vpop.f32.mrf.mxu0 }
 0x494   :  { %1678 = vtanh.f32 %v846_v57 }
 0x4a1   :  { %v1679_v59 = vpop.eup %1678 }
 0x4a2   :  { %1618 = vmatmul.mubr.f32.vlgmr.msra.gmra.mxu0 %v1679_v59 }
 0x54c   :  { %v1124_v0 = vpop.f32.mrf.mxu1 }
 0x54d   :  { %v1125_v5 = vadd.f32 %v1234_v3, %v1124_v0 }
 0x54e   :  { %v1654_v60 = vpop.f32.mrf.mxu1 }
 0x54f   :  { %v1128_v6 = vsub.f32 %v2001_v36, %v1125_v5 }
 0x551   :  { %v1133_v8 = vmul.f32 %v1132_v7, %v1128_v6 }
 0x562   :  { %v1031_v35 = vpop.f32.mrf.mxu0 }
 0x563   :  { %v1032_v62 = vadd.f32 %v1232_v61, %v1031_v35 }
 0x564   :  { %v1619_v63 = vpop.f32.mrf.mxu0 }
 0x565   :  { %v1134_v1 = vsub.f32 0.0, %v1032_v62  ;;  %v1144_v45 = vmul.f32 %v1143_v34, %v1032_v62 }
 0x567   :  { %v1135_v2 = vmul.f32 1.442695, %v1134_v1 }
 0x569   :  { %1680 = vpow2.f32 %v1135_v2 }
 0x576   :  { %v1681_v9 = vpop.eup %1680 }
 0x577   :  { %v1137_v11 = vmul.f32 %v1681_v9, %v1133_v8 }
 0x579   :  { %v1138_v12 = vadd.f32 %v1137_v11, %v2005_v38  ;;  %v1235_v38 = vld [vmem:[%s2116_s4 + $0x9] sm:$0x1] }
 0x57b   :  { %v1145_v13 = vrot.slane %v1138_v12, 4 }
 0x57d   :  { %v1146_v14 = vadd.f32 %v1145_v13, %v1138_v12 }
 0x57f   :  { %v1147_v25 = vrot.slane %v1146_v14, 2 }
 0x581   :  { %v1148_v10 = vadd.f32 %v1147_v25, %v1146_v14 }
 0x583   :  { %v1149_v15 = vrot.slane %v1148_v10, 1 }
 0x585   :  { %v1150_v16 = vadd.f32 %v1149_v15, %v1148_v10 }
 0x587   :  { %v1151_v42 = vmul.f32 0.125, %v1150_v16 }
 0x589   :  { %v1152_v17 = vsub.f32 %v1138_v12, %v1151_v42 }
 0x58b   :  { %v1153_v18 = vmul.f32 %v1152_v17, %v1152_v17 }
 0x58d   :  { %v1154_v26 = vrot.slane %v1153_v18, 4 }
 0x58f   :  { %v1155_v19 = vadd.f32 %v1154_v26, %v1153_v18 }
 0x591   :  { %v1156_v20 = vrot.slane %v1155_v19, 2 }
 0x593   :  { %v1157_v36 = vadd.f32 %v1156_v20, %v1155_v19 }
 0x595   :  { %v1158_v46 = vrot.slane %v1157_v36, 1 }
 0x597   :  { %v1159_v21 = vadd.f32 %v1158_v46, %v1157_v36 }
 0x599   :  { %v1160_v22 = vmul.f32 0.14285715, %v1159_v21 }
 0x59b   :  { %v1161_v23 = vadd.f32 1e-05, %v1160_v22 }
 0x59d   :  { %1682 = vrsqrt.f32 %v1161_v23 }
 0x59e   :  { %1684 = vlog2.f32 %v1161_v23 }
 0x5aa   :  { %v1683_v24 = vpop.eup %1682 }
 0x5ab   :  { %v1685_v28 = vpop.eup %1684  ;;  %v1164_v29 = vmul.f32 %v1683_v24, %v1235_v38 }
 0x5ac   :  { %v1178_v30 = vmul.f32 0.6931472, %v1685_v28 }
 0x5ad   :  { %v1168_v33 = vrot.slane %v1164_v29, %v1862_v32 }
 0x5ae   :  { %v1179_v37 = vmul.f32 0.5, %v1178_v30 }
 0x5af   :  { %v1169_v41 = vmul.f32 %v1168_v33, %v1152_v17 }
 0x5b0   :  { %v1180_v43 = vsub.f32 %v1238_v31, %v1179_v37 }
 0x5b1   :  { %v1175_v44 = vadd.f32 %v1237_v39, %v1169_v41 }
 0x5b2   :  { %v1184_v47 = vrot.slane %v1180_v43, %v1862_v32 }
 0x5b3   :  { %1186 = vst [vmem:[#allocation8] sm:$0xff] %v1175_v44 }
 0x5b4   :  { %v1185_v48 = vadd.f32 %v1184_v47, %v1144_v45 }
 0x5b5   :  { %1757 = shalt.err (!%p1754_p5)
}
 0x5b6   :  { %1199 = dma.vmem_to_hbm [thread:$0]  %s1197_s27, 128, %s2118_s6, [#allocation4]   ;;  %v1188_v49 = vadd.f32 %v1185_v48, %v2007_v40 }
 0x5b7   :  { %s1766_s9 = scalar_lea.vmem %s1207_s29, 128  ;;  %p1771_p7 = scmp.lt.s32.totalorder %s1207_s29, %s1207_s29 }
 0x5b8   :  { %1189 = vst [vmem:[#allocation9] sm:$0xff] %v1188_v49  ;;  %p1767_p6 = scmp.ne.s32.totalorder %s1207_s29, %s1766_s9  ;;  %p1772_p8 = scmp.lt.s32.totalorder %s1766_s9, %s1766_s9 }
 0x5ba   :  { %p1773_p9 = por %p1772_p8, %p1771_p7 }
 0x5bc   :  { %p1774_p10 = pnand %p1773_p9, %p1767_p6 }
 0x5be   :  { %1777 = shalt.err (!%p1774_p10)
}
 0x5bf   :  { %1209 = dma.vmem_to_hbm [thread:$0]  %s1207_s29, 128, %s2119_s7, [#allocation10]  }
 0x5c0   :  { %1790 = dma.done.wait [#allocation4], 128  }
 0x5c1   :  { %1791 = vsyncadd [#allocation4], 4294967168 }
 0x5c2   :  { %1792 = dma.done.wait [#allocation10], 128  }
 0x5c3   :  { %1793 = vsyncadd [#allocation10], 4294967168 }
 0x5c4   :  { %1216 = vsyncpa [#allocation3], 1 }
 0x5c5   :  { %1217 = vsyncpa [#allocation6], 1 }
 0x5c6   :  { %1218 = vsyncpa [#allocation4], 1 }
 0x5c7   :  { %1219 = vsyncpa [#allocation10], 1 }

</bundles_post_ra>
